<compile_context>
chip_gen: v6e
topology: v6e:2x2x1
jax: 0.10.0
libtpu: 0.0.40
codegen_flags: <defaults>
</compile_context>

<pallas_src>
import functools
import math

import jax
import jax.numpy as jnp
from jax import lax
from jax.experimental import pallas as pl
from jax.experimental.pallas import tpu as pltpu

# -------- scaled-down configuration (stand-ins for the full-size model) --------
NUM_CLASSES = 30                  # same as module (29 regions + background)
NUM_REGIONS = NUM_CLASSES - 1     # 29
C_FEAT = 128                      # stand-in for backbone.out_channels = 2048
REP_SIZE = 128                    # stand-in for representation_size = 1024
ROI_OUT = 8                       # feature_map_output_size = 8 (same as module)
IMG_SIZE = 128                    # stand-in for 512 (keeps the /32 feature stride)
ANCHOR_SIZES = (16.0, 32.0)       # stand-in for the 10 anchor sizes
ANCHOR_RATIOS = (0.5, 1.0)        # stand-in for the 16 aspect ratios
NUM_ANCHORS = len(ANCHOR_SIZES) * len(ANCHOR_RATIOS)
NUM_PROPOSALS = 16                # stand-in for post_nms_top_n["testing"] = 1000
HEAD_WIDTH = 2 * 128              # fused predictor head: cols [0,30)=cls, [128,248)=bbox


def _round_up(x, m):
    return (x + m - 1) // m * m


# ----------------------------------------------------------------------------
# Pallas kernel 1: (M,K) @ (K,N) + bias (+ ReLU) on the MXU, bf16 in / f32 acc,
# with an optional K-reduction grid axis (size-robust for the full model).
# ----------------------------------------------------------------------------
def _linear_kernel(a_ref, w_ref, b_ref, o_ref, acc_ref, *, relu):
    @pl.when(pl.program_id(1) == 0)
    def _():
        acc_ref[...] = jnp.zeros_like(acc_ref)

    acc_ref[...] += jnp.dot(a_ref[...], w_ref[...],
                            preferred_element_type=jnp.float32)

    @pl.when(pl.program_id(1) == pl.num_programs(1) - 1)
    def _():
        acc = acc_ref[...] + b_ref[...]
        if relu:
            acc = jnp.maximum(acc, 0.0)
        o_ref[...] = acc.astype(o_ref.dtype)


def pallas_linear(a, w_p, b_p, relu=False, out_dtype=jnp.float32, tk_max=2048):
    """a: (M, K) activations (any float dtype, cast to bf16 here);
       w_p: (Kp, Np) bf16 weights pre-padded in init_params;
       b_p: (1, Np) f32 bias pre-padded.  Returns (M, Np) in out_dtype."""
    M, K = a.shape
    Kp, Np = w_p.shape

    # K-reduction tiling: only engages when Kp is large (e.g. full-size fc1 with
    # Kp = 2048*64 = 131072, whose weight cannot be held untiled in VMEM).
    if Kp > tk_max and Kp % tk_max == 0:
        tk, nk = tk_max, Kp // tk_max
    else:
        tk, nk = Kp, 1

    # M tile: go big when the per-block K*N footprint is small (conv1 case).
    m8 = _round_up(M, 8)
    if tk * Np <= 256 * 128:
        cap = 1024
    elif tk * Np <= 2048 * 128:
        cap = 512
    else:
        cap = 256
    tm = min(m8, cap)
    Mp = _round_up(M, tm)

    a = a.astype(jnp.bfloat16)
    pad_m, pad_k = Mp - M, Kp - K
    if pad_m or pad_k:                       # only when actually misaligned
        a = jnp.pad(a, ((0, pad_m), (0, pad_k)))

    out = pl.pallas_call(
        functools.partial(_linear_kernel, relu=relu),
        out_shape=jax.ShapeDtypeStruct((Mp, Np), out_dtype),
        grid=(Mp // tm, nk),
        in_specs=[
            pl.BlockSpec((tm, tk), lambda i, k: (i, k)),
            pl.BlockSpec((tk, Np), lambda i, k: (k, 0)),
            pl.BlockSpec((1, Np), lambda i, k: (0, 0)),
        ],
        out_specs=pl.BlockSpec((tm, Np), lambda i, k: (i, 0)),
        scratch_shapes=[pltpu.VMEM((tm, Np), jnp.float32)],
        compiler_params=pltpu.CompilerParams(
            dimension_semantics=("parallel", "arbitrary")),
    )(a, w_p, b_p)
    return out[:M]


def conv2d(x, w_p, b_p, cout, k, stride=1, padding=0, relu=False,
           out_dtype=jnp.bfloat16):
    """NHWC conv via im2col (JAX glue) + Pallas MXU GEMM.
    x: (B, H, W, Cin); w_p: pre-padded bf16 (Kp, Np) patch weights."""
    # TODO(synk): fuse im2col into the GEMM kernel (overlapping-window index_map)
    # to avoid the k*k HBM blow-up at full 512x512 / 2048-channel scale.
    patches = lax.conv_general_dilated_patches(
        x, filter_shape=(k, k), window_strides=(stride, stride),
        padding=((padding, padding), (padding, padding)),
        dimension_numbers=("NHWC", "HWIO", "NHWC"))
    Bo, Ho, Wo, Kdim = patches.shape
    out = pallas_linear(patches.reshape(Bo * Ho * Wo, Kdim), w_p, b_p,
                        relu=relu, out_dtype=out_dtype)
    return out[:, :cout].reshape(Bo, Ho, Wo, cout)


# ----------------------------------------------------------------------------
# Pallas kernel 2: fused RoI head  fc1 -> fc2 -> (cls|bbox)  (one call, weights
# resident in VMEM, grid over batch so both TCs work on v7x)
# ----------------------------------------------------------------------------
def _roi_head_kernel(x_ref, w1_ref, b1_ref, w2_ref, b2_ref, wh_ref, bh_ref,
                     feat_ref, logits_ref):
    h = jnp.dot(x_ref[...], w1_ref[...], preferred_element_type=jnp.float32)
    h = jnp.maximum(h + b1_ref[...], 0.0).astype(jnp.bfloat16)          # fc6 + ReLU
    f = jnp.dot(h, w2_ref[...], preferred_element_type=jnp.float32)
    f = jnp.maximum(f + b2_ref[...], 0.0)                               # fc7 + ReLU
    feat_ref[...] = f
    out = jnp.dot(f.astype(jnp.bfloat16), wh_ref[...],
                  preferred_element_type=jnp.float32)
    logits_ref[...] = out + bh_ref[...]                                  # cls | bbox


def roi_head_forward(params, pooled_bf16, batch):
    """pooled_bf16: (B*K, ROI_OUT*ROI_OUT*C_FEAT) bf16.
    Returns box_feats (B*K, REP_SIZE) f32 and fused head logits (B*K, 256) f32."""
    # NOTE: at full scale (C_FEAT=2048, rep=1024) the fc1 weight (256 MiB bf16) does
    # not fit VMEM; fall back to the K-tiled pallas_linear path for that config.
    kp = NUM_PROPOSALS
    kdim = C_FEAT * ROI_OUT * ROI_OUT
    feats, logits = pl.pallas_call(
        _roi_head_kernel,
        out_shape=(jax.ShapeDtypeStruct((batch * kp, REP_SIZE), jnp.float32),
                   jax.ShapeDtypeStruct((batch * kp, HEAD_WIDTH), jnp.float32)),
        grid=(batch,),
        in_specs=[
            pl.BlockSpec((kp, kdim), lambda b: (b, 0)),
            pl.BlockSpec((kdim, REP_SIZE), lambda b: (0, 0)),
            pl.BlockSpec((1, REP_SIZE), lambda b: (0, 0)),
            pl.BlockSpec((REP_SIZE, REP_SIZE), lambda b: (0, 0)),
            pl.BlockSpec((1, REP_SIZE), lambda b: (0, 0)),
            pl.BlockSpec((REP_SIZE, HEAD_WIDTH), lambda b: (0, 0)),
            pl.BlockSpec((1, HEAD_WIDTH), lambda b: (0, 0)),
        ],
        out_specs=(pl.BlockSpec((kp, REP_SIZE), lambda b: (b, 0)),
                   pl.BlockSpec((kp, HEAD_WIDTH), lambda b: (b, 0))),
        compiler_params=pltpu.CompilerParams(dimension_semantics=("parallel",)),
    )(pooled_bf16, params["fc1_w"], params["fc1_b"], params["fc2_w"],
      params["fc2_b"], params["head_w"], params["head_b"])
    return feats, logits


# ----------------------------------------------------------------------------
# Pallas kernel 3: per-image softmax + top-1 class + per-class best-RoI feature.
# Also emits the softmax probs so detections use the SAME softmax (lane-dense,
# class axis padded to 128).
# ----------------------------------------------------------------------------
def _region_select_kernel(logits_ref, feats_ref, topfeat_ref, det_ref, probs_ref,
                          *, num_classes):
    logits = logits_ref[0]                                    # (K, 128) f32 (padded cls)
    feats = feats_ref[0]                                      # (K, R)
    cls_idx = lax.broadcasted_iota(jnp.int32, logits.shape, 1)
    valid = cls_idx < num_classes
    masked_logits = jnp.where(valid, logits, jnp.float32(-1e30))
    m = jnp.max(masked_logits, axis=-1, keepdims=True)
    e = jnp.where(valid, jnp.exp(masked_logits - m), 0.0)
    probs = e * pl.reciprocal(jnp.sum(e, axis=-1, keepdims=True), approx=True)
    probs_ref[0] = probs
    # top-1 class per RoI (excluding background col 0 and padded cols)
    row_max = jnp.max(probs, axis=-1, keepdims=True)          # (K, 1)
    is_top = probs >= row_max                                  # (K, 128)
    is_region = (cls_idx >= 1) & valid
    masked = jnp.where(is_top & is_region, probs, -1.0)        # (K, 128)
    col_max = jnp.max(masked, axis=0, keepdims=True)           # (1, 128)
    detected = col_max > 0.0                                    # class top-1 for >=1 RoI
    sel = jnp.where((masked >= col_max) & detected, 1.0, 0.0)   # one-hot best RoI per class
    # note: exact probability ties average features over tied RoIs (torchvision argmax
    # would pick a single one); ties are measure-zero with float scores.
    cnt = jnp.maximum(jnp.sum(sel, axis=0, keepdims=True), 1.0)
    sel = sel / cnt
    # gather-by-matmul on the MXU: (C, K) @ (K, R) -> (C, R)
    topf = lax.dot_general(sel, feats, (((0,), (0,)), ((), ())),
                           preferred_element_type=jnp.float32)
    topfeat_ref[0] = topf
    det_ref[0] = detected.astype(jnp.float32)


def region_selection(head_logits, box_feats):
    """head_logits: (B*K, 256) f32 (cols [0,30) are class logits);
       box_feats: (B*K, REP_SIZE) f32."""
    bk = head_logits.shape[0]
    batch = bk // NUM_PROPOSALS
    kp = NUM_PROPOSALS
    r = box_feats.shape[-1]
    logits3 = head_logits.reshape(batch, kp, HEAD_WIDTH)
    feats3 = box_feats.reshape(batch, kp, r)
    topfeat, det, probs = pl.pallas_call(
        functools.partial(_region_select_kernel, num_classes=NUM_CLASSES),
        out_shape=(jax.ShapeDtypeStruct((batch, 128, r), jnp.float32),
                   jax.ShapeDtypeStruct((batch, 1, 128), jnp.float32),
                   jax.ShapeDtypeStruct((batch, kp, 128), jnp.float32)),
        grid=(batch,),
        in_specs=[pl.BlockSpec((1, kp, 128), lambda b: (b, 0, 0)),   # first 128 cols = cls
                  pl.BlockSpec((1, kp, r), lambda b: (b, 0, 0))],
        out_specs=(pl.BlockSpec((1, 128, r), lambda b: (b, 0, 0)),
                   pl.BlockSpec((1, 1, 128), lambda b: (b, 0, 0)),
                   pl.BlockSpec((1, kp, 128), lambda b: (b, 0, 0))),
        compiler_params=pltpu.CompilerParams(dimension_semantics=("parallel",)),
    )(logits3, feats3)
    top_region_features = topfeat[:, 1:NUM_CLASSES, :]        # drop background -> (B, 29, R)
    class_detected = det[:, 0, 1:NUM_CLASSES] > 0.5           # (B, 29) bool
    probs_out = probs[:, :, :NUM_CLASSES]                     # (B, K, 30)
    return top_region_features, class_detected, probs_out


# ----------------------------------------------------------------------------
# JAX glue: anchors, box coding, RoI-align, parameters
# ----------------------------------------------------------------------------
def make_anchors(hf, wf, stride):
    ws, hs = [], []
    for s in ANCHOR_SIZES:
        for ratio in ANCHOR_RATIOS:
            ws.append(s / math.sqrt(ratio))
            hs.append(s * math.sqrt(ratio))
    ws = jnp.array(ws, jnp.float32)
    hs = jnp.array(hs, jnp.float32)
    cx = (jnp.arange(wf, dtype=jnp.float32) + 0.5) * stride
    cy = (jnp.arange(hf, dtype=jnp.float32) + 0.5) * stride
    cxg, cyg = jnp.meshgrid(cx, cy)
    cxg = cxg.reshape(-1, 1)
    cyg = cyg.reshape(-1, 1)
    x1 = cxg - ws / 2
    y1 = cyg - hs / 2
    x2 = cxg + ws / 2
    y2 = cyg + hs / 2
    return jnp.stack([x1, y1, x2, y2], axis=-1).reshape(-1, 4)   # (hf*wf*A, 4)


def decode_boxes(ref_boxes, deltas):
    wa = ref_boxes[..., 2] - ref_boxes[..., 0]
    ha = ref_boxes[..., 3] - ref_boxes[..., 1]
    cxa = ref_boxes[..., 0] + wa / 2
    cya = ref_boxes[..., 1] + ha / 2
    dx, dy = deltas[..., 0], deltas[..., 1]
    dw = jnp.minimum(deltas[..., 2], math.log(1000.0 / 16.0))
    dh = jnp.minimum(deltas[..., 3], math.log(1000.0 / 16.0))
    cx = dx * wa + cxa
    cy = dy * ha + cya
    w = jnp.exp(dw) * wa
    h = jnp.exp(dh) * ha
    return jnp.stack([cx - w / 2, cy - h / 2, cx + w / 2, cy + h / 2], axis=-1)


def clip_boxes(boxes, size):
    return jnp.clip(boxes, 0.0, float(size))


def roi_align(feat, boxes, out_size, scale):
    """Simplified RoI-Align (bilinear at bin centers) for one image.
    feat: (Hf, Wf, C); boxes: (K, 4) in image coords."""
    # TODO(synk): sampling_ratio=2 sub-sample averaging of torchvision RoIAlign omitted,
    # and at full scale this bilinear gather should move into a Pallas DMA-gather kernel.
    hf, wf, _ = feat.shape
    x1, y1, x2, y2 = [boxes[:, i] * scale for i in range(4)]
    bw = (x2 - x1) / out_size
    bh = (y2 - y1) / out_size
    centers = jnp.arange(out_size, dtype=jnp.float32) + 0.5
    xs = x1[:, None] + centers[None, :] * bw[:, None]
    ys = y1[:, None] + centers[None, :] * bh[:, None]
    xx = jnp.clip(xs[:, None, :], 0.0, wf - 1.0) * jnp.ones((1, out_size, 1))
    yy = jnp.clip(ys[:, :, None], 0.0, hf - 1.0) * jnp.ones((1, 1, out_size))
    x0 = jnp.floor(xx).astype(jnp.int32)
    y0 = jnp.floor(yy).astype(jnp.int32)
    x1i = jnp.minimum(x0 + 1, wf - 1)
    y1i = jnp.minimum(y0 + 1, hf - 1)
    wx = xx - x0
    wy = yy - y0
    flat = feat.reshape(hf * wf, -1)

    def g(yi, xi):
        return flat[yi * wf + xi]                              # (K, S, S, C)

    out = (g(y0, x0) * ((1 - wy) * (1 - wx))[..., None]
           + g(y0, x1i) * ((1 - wy) * wx)[..., None]
           + g(y1i, x0) * (wy * (1 - wx))[..., None]
           + g(y1i, x1i) * (wy * wx)[..., None])
    return out                                                 # (K, S, S, C) f32


def init_params(key):
    """All GEMM weights are pre-padded to (8,128)-aligned tiles and pre-cast to bf16
    ONCE here (biases stay f32, pre-padded), so no per-call padding copies."""
    ks = jax.random.split(key, 12)

    def w(k, shape, scale):
        return jax.random.normal(k, shape, jnp.float32) * scale

    def pad_w(wt):
        kdim, n = wt.shape
        kp, npad = _round_up(kdim, 128), _round_up(n, 128)
        return jnp.zeros((kp, npad), jnp.bfloat16).at[:kdim, :n].set(
            wt.astype(jnp.bfloat16))

    def zbias(npad):
        return jnp.zeros((1, npad), jnp.float32)

    p = {}
    # Backbone (scaled-down ResNet-50 stand-in). TODO(synk): full bottleneck stack + BatchNorm omitted.
    p["conv1_w"] = pad_w(w(ks[0], (7 * 7 * 1, 16), 0.05)); p["conv1_b"] = zbias(128)   # conv1: no bias
    p["conv2_w"] = pad_w(w(ks[1], (3 * 3 * 16, 32), 0.05)); p["conv2_b"] = zbias(128)
    p["conv3_w"] = pad_w(w(ks[2], (3 * 3 * 32, 64), 0.05)); p["conv3_b"] = zbias(128)
    p["conv4_w"] = pad_w(w(ks[3], (3 * 3 * 64, C_FEAT), 0.05)); p["conv4_b"] = zbias(128)
    # RPN head: 3x3 conv, then fused (objectness | box-deltas) 1x1 head (cols 0:4 | 4:20)
    p["rpn_conv_w"] = pad_w(w(ks[4], (3 * 3 * C_FEAT, C_FEAT), 0.02)); p["rpn_conv_b"] = zbias(128)
    rpn_cls = w(ks[5], (C_FEAT, NUM_ANCHORS), 0.02)
    rpn_reg = w(ks[6], (C_FEAT, NUM_ANCHORS * 4), 0.02)
    p["rpn_head_w"] = pad_w(jnp.concatenate([rpn_cls, rpn_reg], axis=1))   # (128, 20) -> (128, 128)
    p["rpn_head_b"] = zbias(128)
    # TwoMLPHead
    p["fc1_w"] = pad_w(w(ks[7], (C_FEAT * ROI_OUT * ROI_OUT, REP_SIZE), 0.01)); p["fc1_b"] = zbias(REP_SIZE)
    p["fc2_w"] = pad_w(w(ks[8], (REP_SIZE, REP_SIZE), 0.02)); p["fc2_b"] = zbias(REP_SIZE)
    # FastRCNNPredictor, fused: cols [0,30) = class logits, [128,248) = bbox deltas
    cls_w = w(ks[9], (REP_SIZE, NUM_CLASSES), 0.02)
    bbox_w = w(ks[10], (REP_SIZE, NUM_CLASSES * 4), 0.02)
    head_w = jnp.zeros((REP_SIZE, HEAD_WIDTH), jnp.bfloat16)
    head_w = head_w.at[:, :NUM_CLASSES].set(cls_w.astype(jnp.bfloat16))
    head_w = head_w.at[:, 128:128 + NUM_CLASSES * 4].set(bbox_w.astype(jnp.bfloat16))
    p["head_w"] = head_w
    p["head_b"] = jnp.zeros((1, HEAD_WIDTH), jnp.float32)
    return p


# ----------------------------------------------------------------------------
# Forward pass (eval mode, targets=None, return_feature_vectors=True)
# ----------------------------------------------------------------------------
def object_detector_forward(params, images_nchw):
    B = images_nchw.shape[0]
    x = jnp.transpose(images_nchw, (0, 2, 3, 1)).astype(jnp.float32)   # NCHW -> NHWC

    # --- backbone (bf16 activation chain after conv1/maxpool) ---
    x = conv2d(x, params["conv1_w"], params["conv1_b"], cout=16, k=7,
               stride=2, padding=3, relu=True, out_dtype=jnp.float32)
    x = lax.reduce_window(x, -jnp.inf, lax.max, (1, 3, 3, 1), (1, 2, 2, 1),
                          ((0, 0), (1, 1), (1, 1), (0, 0)))            # maxpool 3x3/2
    x = conv2d(x, params["conv2_w"], params["conv2_b"], cout=32, k=3, stride=2, padding=1, relu=True)
    x = conv2d(x, params["conv3_w"], params["conv3_b"], cout=64, k=3, stride=2, padding=1, relu=True)
    feat = conv2d(x, params["conv4_w"], params["conv4_b"], cout=C_FEAT, k=3, stride=2, padding=1, relu=True)
    _, Hf, Wf, Cf = feat.shape                                          # (B, 4, 4, 128) bf16

    # --- RPN (fused objectness+box-delta head, one GEMM) ---
    t = conv2d(feat, params["rpn_conv_w"], params["rpn_conv_b"], cout=C_FEAT, k=3,
               stride=1, padding=1, relu=True)
    t2d = t.reshape(B * Hf * Wf, Cf)
    rpn_out = pallas_linear(t2d, params["rpn_head_w"], params["rpn_head_b"],
                            out_dtype=jnp.float32)                      # (B*Hf*Wf, 128)
    obj = rpn_out[:, :NUM_ANCHORS].reshape(B, Hf * Wf * NUM_ANCHORS)
    rpn_deltas = rpn_out[:, NUM_ANCHORS:NUM_ANCHORS * 5].reshape(B, Hf * Wf * NUM_ANCHORS, 4)
    anchors = make_anchors(Hf, Wf, IMG_SIZE // Hf)
    prop_boxes = clip_boxes(decode_boxes(anchors, rpn_deltas), IMG_SIZE)
    # TODO(synk): RPN NMS and proposal/target sampling (data-dependent) omitted; plain top-k by objectness.
    _, top_idx = lax.top_k(obj, NUM_PROPOSALS)
    proposals = jnp.take_along_axis(prop_boxes, top_idx[..., None], axis=1)   # (B, K, 4)

    # --- RoI heads (single fused Pallas kernel: fc1 -> fc2 -> cls|bbox) ---
    # TODO(synk): bilinear gather of RoI-Align stays in JAX (no clean Pallas gather equivalent).
    pooled = jax.vmap(roi_align, in_axes=(0, 0, None, None))(
        feat, proposals, ROI_OUT, float(Hf) / IMG_SIZE)                 # (B, K, 8, 8, C)
    pooled = pooled.reshape(B * NUM_PROPOSALS, ROI_OUT * ROI_OUT * Cf).astype(jnp.bfloat16)
    box_feats, head_logits = roi_head_forward(params, pooled, B)        # (B*K,128), (B*K,256)

    # --- top_region_features / class_detected / shared softmax (Pallas kernel) ---
    top_region_features, class_detected, probs = region_selection(head_logits, box_feats)

    # --- detections (eval mode) ---
    # TODO(synk): score_thresh / NMS / detections_per_img filtering (data-dependent shapes) omitted.
    fg = probs[:, :, 1:]                                                # same softmax as class_detected
    det_scores = jnp.max(fg, axis=-1)
    det_labels = jnp.argmax(fg, axis=-1) + 1
    box_deltas = head_logits.reshape(B, NUM_PROPOSALS, HEAD_WIDTH)[
        :, :, 128:128 + NUM_CLASSES * 4].reshape(B, NUM_PROPOSALS, NUM_CLASSES, 4)
    sel_d = jnp.take_along_axis(box_deltas, det_labels[..., None, None], axis=2)[:, :, 0, :]
    det_boxes = clip_boxes(decode_boxes(proposals, sel_d), IMG_SIZE)
    detections = [{"boxes": det_boxes[b], "labels": det_labels[b], "scores": det_scores[b]}
                  for b in range(B)]

    # eval mode with targets=None -> empty loss dict (matches the module)
    # TODO(synk): training-mode RPN/ROI losses require target matching/sampling; not implemented.
    losses = {}
    return losses, detections, top_region_features, class_detected


if __name__ == "__main__":
    key = jax.random.PRNGKey(0)
    images = jax.random.normal(key, (2, 1, IMG_SIZE, IMG_SIZE), jnp.float32)   # [B, 1, H, W], NCHW
    params = init_params(jax.random.PRNGKey(42))

    losses, detections, top_region_features, class_detected = object_detector_forward(params, images)

    jax.block_until_ready(top_region_features)
    jax.block_until_ready(class_detected)
    jax.block_until_ready(detections[0]["boxes"])

    assert isinstance(losses, dict) and len(losses) == 0
    assert top_region_features.shape == (2, NUM_REGIONS, REP_SIZE)
    assert class_detected.shape == (2, NUM_REGIONS) and class_detected.dtype == jnp.bool_
    assert detections[0]["boxes"].shape == (NUM_PROPOSALS, 4)
    print("KERNEL_OK")
</pallas_src>

<mosaic_0001>
module attributes {stable_mosaic.version = 11 : i64} {
  func.func @_linear_kernel(%arg0: i32, %arg1: i32, %arg2: memref<1024x128xbf16, #tpu.memory_space<vmem>>, %arg3: memref<128x128xbf16, #tpu.memory_space<vmem>>, %arg4: memref<1x128xf32, #tpu.memory_space<vmem>>, %arg5: memref<1024x128xf32, #tpu.memory_space<vmem>>, %arg6: memref<1024x128xf32, #tpu.memory_space<vmem>>) attributes {dimension_semantics = [#tpu.dimension_semantics<parallel>, #tpu.dimension_semantics<arbitrary>], iteration_bounds = array<i64: 8, 1>, scalar_prefetch = 0 : i64, scratch_operands = 1 : i64, tpu.core_type = #tpu.core_type<tc>, window_params = [{transform_indices = @transform_0, window_bounds = array<i64: 1024, 128>}, {transform_indices = @transform_1, window_bounds = array<i64: 128, 128>}, {pipeline_mode = #tpu.pipeline_mode<synchronous>, transform_indices = @transform_2, window_bounds = array<i64: 1, 128>}, {transform_indices = @transform_3, window_bounds = array<i64: 1024, 128>}]} {
    %c0_i32 = arith.constant 0 : i32
    %0 = arith.cmpi eq, %arg1, %c0_i32 : i32
    %1 = arith.extui %0 : i1 to i32
    %c0_i32_0 = arith.constant 0 : i32
    %2 = arith.cmpi ne, %1, %c0_i32_0 : i32
    scf.if %2 {
      %cst_10 = arith.constant 0.000000e+00 : f32
      %12 = vector.broadcast %cst_10 : f32 to vector<1024x128xf32>
      %c0_11 = arith.constant 0 : index
      %c0_12 = arith.constant 0 : index
      %13 = vector.load %arg6[%c0_11, %c0_12] : memref<1024x128xf32, #tpu.memory_space<vmem>>, vector<1024x128xf32>
      tpu.vector_store %arg6[%c0_11, %c0_12], %12 {strides = array<i32>} : memref<1024x128xf32, #tpu.memory_space<vmem>>, vector<1024x128xf32>,
    } else {
    }
    %c0 = arith.constant 0 : index
    %c0_1 = arith.constant 0 : index
    %3 = vector.load %arg6[%c0, %c0_1] : memref<1024x128xf32, #tpu.memory_space<vmem>>, vector<1024x128xf32>
    %c0_2 = arith.constant 0 : index
    %c0_3 = arith.constant 0 : index
    %4 = vector.load %arg2[%c0_2, %c0_3] : memref<1024x128xbf16, #tpu.memory_space<vmem>>, vector<1024x128xbf16>
    %c0_4 = arith.constant 0 : index
    %c0_5 = arith.constant 0 : index
    %5 = vector.load %arg3[%c0_4, %c0_5] : memref<128x128xbf16, #tpu.memory_space<vmem>>, vector<128x128xbf16>
    %cst = arith.constant dense<0.000000e+00> : vector<1024x128xf32>
    %6 = tpu.matmul %4, %5, %cst {dimension_numbers = #tpu.dot_dimension_numbers<[1], [0], [0], [1], [0, 0, 1, 1], [], []>} : vector<1024x128xbf16>, vector<128x128xbf16>, vector<1024x128xf32> -> vector<1024x128xf32>
    %7 = arith.addf %3, %6 : vector<1024x128xf32>
    %c0_6 = arith.constant 0 : index
    %c0_7 = arith.constant 0 : index
    %8 = vector.load %arg6[%c0_6, %c0_7] : memref<1024x128xf32, #tpu.memory_space<vmem>>, vector<1024x128xf32>
    tpu.vector_store %arg6[%c0_6, %c0_7], %7 {strides = array<i32>} : memref<1024x128xf32, #tpu.memory_space<vmem>>, vector<1024x128xf32>,
    %c0_i32_8 = arith.constant 0 : i32
    %9 = arith.cmpi eq, %arg1, %c0_i32_8 : i32
    %10 = arith.extui %9 : i1 to i32
    %c0_i32_9 = arith.constant 0 : i32
    %11 = arith.cmpi ne, %10, %c0_i32_9 : i32
    scf.if %11 {
      %c0_10 = arith.constant 0 : index
      %c0_11 = arith.constant 0 : index
      %12 = vector.load %arg6[%c0_10, %c0_11] : memref<1024x128xf32, #tpu.memory_space<vmem>>, vector<1024x128xf32>
      %c0_12 = arith.constant 0 : index
      %c0_13 = arith.constant 0 : index
      %13 = vector.load %arg4[%c0_12, %c0_13] : memref<1x128xf32, #tpu.memory_space<vmem>>, vector<1x128xf32>
      %14 = vector.broadcast %13 : vector<1x128xf32> to vector<1024x128xf32>
      %15 = arith.addf %12, %14 : vector<1024x128xf32>
      %cst_14 = arith.constant 0.000000e+00 : f32
      %16 = vector.broadcast %cst_14 : f32 to vector<1024x128xf32>
      %17 = arith.maximumf %15, %16 : vector<1024x128xf32>
      %c0_15 = arith.constant 0 : index
      %c0_16 = arith.constant 0 : index
      %18 = vector.load %arg5[%c0_15, %c0_16] : memref<1024x128xf32, #tpu.memory_space<vmem>>, vector<1024x128xf32>
      tpu.vector_store %arg5[%c0_15, %c0_16], %17 {strides = array<i32>} : memref<1024x128xf32, #tpu.memory_space<vmem>>, vector<1024x128xf32>,
    } else {
    }
    return
  }
  func.func @transform_0(%arg0: i32, %arg1: i32) -> (i32, i32) {
    %c0_i32 = arith.constant 0 : i32
    return %arg0, %arg1 : i32, i32
  }
  func.func @transform_1(%arg0: i32, %arg1: i32) -> (i32, i32) {
    %c0_i32 = arith.constant 0 : i32
    %c0_i32_0 = arith.constant 0 : i32
    return %arg1, %c0_i32 : i32, i32
  }
  func.func @transform_2(%arg0: i32, %arg1: i32) -> (i32, i32) {
    %c0_i32 = arith.constant 0 : i32
    %c0_i32_0 = arith.constant 0 : i32
    %c0_i32_1 = arith.constant 0 : i32
    return %c0_i32, %c0_i32_0 : i32, i32
  }
  func.func @transform_3(%arg0: i32, %arg1: i32) -> (i32, i32) {
    %c0_i32 = arith.constant 0 : i32
    %c0_i32_0 = arith.constant 0 : i32
    return %arg0, %c0_i32 : i32, i32
  }
}

</mosaic_0001>

<bundles_post_ra>
// kernel: tpu_custom_call.1
= control target key start
LH: loop header
LB: loop body
LE: loop exit
PB: predicated region body
PF: predicated region fallthrough
CT: control target
= control target key end

     0   :  { %8 = vsyncpa [#allocation4], 0  ;;  %s3719_s0 = inlined_call_operand.hbm [shape: bf16[8192,128], index: 0, kind: input, shape index: {}]   ;;  %s3720_s1 = inlined_call_operand.hbm [shape: bf16[128,128], index: 1, kind: input, shape index: {}]   ;;  %s3721_s2 = inlined_call_operand.hbm [shape: f32[1,128], index: 2, kind: input, shape index: {}]   ;;  %s3722_s3 = inlined_call_operand.hbm [shape: f32[8192,128], index: 3, kind: output, shape index: {}]  }
   0x1   :  { %10 = vsyncpa [#allocation4 + $0x1], 0 }
   0x2   :  { %11 = vsyncpa [#allocation7], 0 }
   0x3   :  { %12 = vsyncpa [#allocation5], 0 }
   0x4   :  { %14 = vsyncpa [#allocation5 + $0x1], 0  ;;  %s3199_s12 = smov 0   ;;  %s3201_s13 = smov 0  }
   0x5   :  { %s3203_s14 = smov 0   ;;  %s3205_s15 = smov 0  }
   0x6   :  { %s3207_s16 = smov 0   ;;  %s3209_s17 = smov 0  }
   0x7 LB: > { %s2520_s18 = sadd.s32 4294967295, %s3169_s17   ;;  %s2521_s19 = sadd.s32 4294967294, %s3169_s17   ;;  %s3169_s17 = sphi %s3209_s17, %s20_s17   ;;  %s3165_s16 = sphi %s3207_s16, %s3738_s16   ;;  %s3161_s15 = sphi %s3205_s15, %s3737_s15   ;;  %s3157_s14 = sphi %s3203_s14, %s3736_s14   ;;  %s3153_s13 = sphi %s3201_s13, %s3735_s13   ;;  %s3149_s12 = sphi %s3199_s12, %s3734_s12  }
   0x8   : > { %p54_p0 = scmp.ne.s32.totalorder %s3153_s13, %s3149_s12  ;;  %p3233_p1 = scmp.eq.s32.totalorder %s2520_s18, 0 }
   0x9   : > { %p3237_p2 = scmp.eq.s32.totalorder %s2520_s18, 7  ;;  %p131_p3 = scmp.eq.s32.totalorder %s2521_s19, 7 }
   0xa   : > { %p3243_p4 = por %p3233_p1, %p54_p0  ;;  %p2522_p5 = scmp.ge.s32.totalorder %s3169_s17, 1 }
   0xb   : > { %p3248_p6 = por %p131_p3, %p54_p0  ;;  %p138_p7 = scmp.lt.s32.totalorder %s3169_s17, 9 }
   0xc   : > { %s3171_s25 = smov [#allocation6]   ;;  %s3172_s28 = smov [#allocation8]  }
   0xd   : > { %s3727_s23 = scalar_select %p3248_p6, 1, 0 }
   0xe   : > { %p3253_p8 = pnand %p2522_p5, %p138_p7  ;;  %s153_s26 = sshll.u32 %s3171_s25, 4  ;;  %s154_s26 = int_to_ptr.vmem [resolvable:$true] %s153_s26 }
   0xf   : > { %s167_s29 = sshll.u32 %s3172_s28, 4  ;;  %s3016_s30 = scalar_lea.vmem %s154_s26, 1024  ;;  %s168_s29 = int_to_ptr.vmem [resolvable:$true] %s167_s29 }
  0x10   : > { %p2858_p9 = pneg %p3253_p8  ;;  %p3017_p12 = scmp.ne.s32.totalorder %s154_s26, %s3016_s30 }
  0x11   : > { %p3024_p3 = scmp.lt.s32.totalorder %s154_s26, %s154_s26  ;;  %p3025_p5 = scmp.lt.s32.totalorder %s3016_s30, %s3016_s30 }
  0x12   : > { %p3261_p10 = pnand %p2858_p9, %p3233_p1 }
  0x13   : > { %p3026_p7 = por %p3025_p5, %p3024_p3 }
  0x14   : > { %p3007_p11 = pneg %p3261_p10 }
  0x16   : > { %p3019_p13 = pnand %p3017_p12, %p3007_p11 }
  0x18   : > { %p3020_p0 = pneg %p3019_p13 }
  0x1a   : > { %p3027_p9 = pnand %p3026_p7, %p3020_p0 }
  0x1c   : > { %3030 = shalt.err (!%p3027_p9)
}
  0x1d   : > { %s3723_s4 = smov 64   ;;  %s3174_s5 = smov 4  }
  0x1e   : > { %2861 = dma.hbm_to_vmem [thread:$0]  (!%p3261_p10), %s3720_s1, 1024, %s154_s26, [#allocation7], %s3723_s4, %s3723_s4, %s3174_s5  }
  0x1f   : > { %s3042_s8 = scalar_lea.vmem %s168_s29, 16  ;;  %s3049_s9 = scalar_lea.vmem %s168_s29, 32 }
  0x20   : > { %p3043_p12 = scmp.ne.s32.totalorder %s168_s29, %s3042_s8  ;;  %p3050_p0 = scmp.lt.s32.totalorder %s168_s29, %s168_s29 }
  0x21   : > { %p3051_p5 = scmp.lt.s32.totalorder %s3049_s9, %s3042_s8 }
  0x22   : > { %p3045_p13 = pnand %p3043_p12, %p3007_p11 }
  0x23   : > { %p3052_p7 = por %p3051_p5, %p3050_p0 }
  0x24   : > { %p3046_p3 = pneg %p3045_p13 }
  0x26   : > { %p3053_p9 = pnand %p3052_p7, %p3046_p3 }
  0x28   : > { %3056 = shalt.err (!%p3053_p9)
}
  0x29   : > { %2864 = dma.hbm_to_vmem [thread:$0]  (!%p3261_p10), %s3721_s2, 16, %s168_s29, [#allocation7]  }
  0x2a   : > { %s32_s18 = sadd.s32 1, %s3165_s16  ;;  %s41_s19 = sadd.s32 1, %s3157_s14 }
  0x2b   : > { %p34_p11 = scmp.ge.s32.totalorder %s32_s18, 8  ;;  %p48_p12 = scmp.ne.s32.totalorder %s3157_s14, %s3153_s13 }
  0x2c   : > { %p49_p13 = scmp.eq.s32.totalorder %s3169_s17, 0  ;;  %p2875_p3 = scmp.lt.s32.totalorder %s3169_s17, 8 }
  0x2d   : > { %s3740_s18 = smov (%p34_p11, %s32_s18), 0  ;;  %p3296_p5 = por %p3237_p2, %p48_p12 }
  0x2e   : > { %p50_p0 = por %p49_p13, %p48_p12  ;;  %s36_s26 = ssub.s32 %s3165_s16, %s3740_s18 }
  0x2f   : > { %s178_s27 = sand.u32 1, %s3157_s14   ;;  %p39_p7 = scmp.eq.s32.totalorder %s36_s26, 0 }
  0x30   : > { %s2526_s28 = sshll.u32 %s178_s27, 9  ;;  %s2612_s29 = sshll.u32 %s3165_s16, 13 }
  0x31   : > { %s3305_s30 = scalar_select %p39_p7, %s3157_s14, %s41_s19  }
  0x32   : > { %s189_s8 = scalar_lea.hbm %s3719_s0, %s2612_s29  ;;  %s182_s9 = scalar_lea.vmem [#allocation3], %s2526_s28 }
  0x33   : > { %s190_s10 = sshll.u32 %s182_s9, 4  ;;  %p3312_p10 = pnand %p2875_p3, %p50_p0  ;;  %s191_s10 = int_to_ptr.vmem [resolvable:$true] %s190_s10 }
  0x34   : > { %s179_s11 = scalar_lea.sflag [#allocation4], %s178_s27  ;;  %s3070_s26 = scalar_lea.vmem %s191_s10, 8192 }
  0x35   : > { %p3059_p2 = pneg %p3312_p10  ;;  %p3071_p9 = scmp.ne.s32.totalorder %s191_s10, %s3070_s26 }
  0x36   : > { %s3175_s19 = smov [#allocation3]  }
  0x37   : > { %p3073_p11 = pnand %p3071_p9, %p3059_p2  ;;  %s3075_s4 = sshll.u32 %s3175_s19, 4  ;;  %s3076_s4 = int_to_ptr.vmem [resolvable:$false] %s3075_s4 }
  0x38   : > { %s3077_s29 = scalar_lea.vmem %s3076_s4, 16384  ;;  %p3078_p13 = scmp.lt.s32.totalorder %s191_s10, %s3076_s4 }
  0x39   : > { %p3074_p12 = pneg %p3073_p11  ;;  %p3079_p7 = scmp.lt.s32.totalorder %s3077_s29, %s3070_s26 }
  0x3b   : > { %p3080_p6 = por %p3079_p7, %p3078_p13 }
  0x3d   : > { %p3081_p3 = pnand %p3080_p6, %p3074_p12 }
  0x3f   : > { %3084 = shalt.err (!%p3081_p3)
}
  0x40   : > { %s3732_s28 = smov 64   ;;  %202 = sbr.rel (%p3253_p8) target bundleno = 442 (0x1ba), region = 32 }
  0x41   : > { %2868 = dma.hbm_to_vmem [thread:$0]  (!%p3312_p10), %s189_s8, 8192, %s191_s10, %s179_s11, %s3732_s28, %s3732_s28, %s3174_s5  }
  0x42   : > { %s3326_s27 = sand.u32 (!%p3253_p8), 1, %s3153_s13  }
  0x43   : > { %s2530_s4 = sshll.u32 (!%p3253_p8), %s3326_s27, 9  ;;  %s205_s6 = scalar_lea.sflag (!%p3253_p8), [#allocation4], %s3326_s27 }
  0x44   : > { %s3330_s7 = scalar_lea.vmem (!%p3253_p8), [#allocation3], %s2530_s4 }
  0x45   : > { %3136 = dma.done.wait (%p3243_p4), %s205_s6, 8192  }
  0x46   : > { %3138 = vsyncadd (%p3243_p4), %s205_s6, 4294959104 }
  0x47   : > { %3140 = dma.done.wait (%p3233_p1), [#allocation7], 1040  }
  0x48   : > { %3142 = vsyncadd (%p3233_p1), [#allocation7], 4294966256  ;;  %v2933_v0 = vld [vmem:[#allocation6 + $0x38] sm:$0xff]   ;;  %v2934_v1 = vld [vmem:[#allocation6 + $0x30] sm:$0xff]   ;;  %s2533_s20 = sshll.u32 %s3326_s27, 10  ;;  %s2613_s24 = sshll.u32 %s3161_s15, 14 }
  0x49   : > { %2686 = vmatprep.subr.bf16.mxu0 %v2933_v0  ;;  %2830 = vmatprep.subr.bf16.mxu1 %v2933_v0  ;;  %v2935_v2 = vld [vmem:[#allocation6 + $0x28] sm:$0xff]   ;;  %v2936_v3 = vld [vmem:[#allocation6 + $0x20] sm:$0xff]   ;;  %v2937_v6 = vld [vmem:[#allocation6 + $0x18] sm:$0xff]   ;;  %s3411_s22 = scalar_lea.vmem [#allocation9], %s2533_s20  ;;  %s3666_s10 = scalar_lea.hbm %s3722_s3, %s2613_s24 }
  0x4a   : > { %2687 = vmatpush3.bf16.msra.mxu0 %v2933_v0  ;;  %2838 = vmatpush3.bf16.msra.mxu1 %v2933_v0  ;;  %v2941_v4 = vld [vmem:[%s3330_s7] sm:$0xff]   ;;  %v2938_v7 = vld [vmem:[#allocation6 + $0x10] sm:$0xff]   ;;  %v2939_v8 = vld [vmem:[#allocation6 + $0x8] sm:$0xff]   ;;  %s2416_s5 = sshll.u32 %s3411_s22, 4  ;;  %s2403_s15 = scalar_lea.sflag [#allocation5], %s3326_s27  ;;  %s3668_s5 = int_to_ptr.vmem [resolvable:$true] %s2416_s5 }
  0x4b   : > { %2688 = vmatprep.subr.bf16.mxu0 %v2934_v1  ;;  %2831 = vmatprep.subr.bf16.mxu1 %v2934_v1  ;;  %v2942_v5 = vld [vmem:[%s3330_s7 + $0x100] sm:$0xff]   ;;  %v2943_v10 = vld [vmem:[%s3330_s7 + $0x8] sm:$0xff]   ;;  %v2945_v12 = vld [vmem:[%s3330_s7 + $0x10] sm:$0xff]   ;;  %s3085_s21 = scalar_lea.vmem %s3668_s5, 16384  ;;  %s3176_s11 = smov [#allocation9]  }
  0x4c   : > { %2702 = vmatprep.mubr.bf16.mxu0 %v2941_v4  ;;  %2766 = vmatprep.mubr.bf16.mxu1 %v2942_v5  ;;  %v2940_v9 = vld [vmem:[#allocation6] sm:$0xff]   ;;  %v2944_v11 = vld [vmem:[%s3330_s7 + $0x108] sm:$0xff]   ;;  %v2946_v13 = vld [vmem:[%s3330_s7 + $0x110] sm:$0xff]   ;;  %p3086_p1 = scmp.ne.s32.totalorder %s3668_s5, %s3085_s21  ;;  %s3089_s26 = sshll.u32 %s3176_s11, 4  ;;  %s3090_s26 = int_to_ptr.vmem [resolvable:$false] %s3089_s26 }
  0x4d   : > { %v2947_v14 = vld [vmem:[%s3330_s7 + $0x18] sm:$0xff]   ;;  %v2949_v16 = vld [vmem:[%s3330_s7 + $0x20] sm:$0xff]   ;;  %v2951_v18 = vld [vmem:[%s3330_s7 + $0x28] sm:$0xff]   ;;  %s3091_s19 = scalar_lea.vmem %s3090_s26, 32768  ;;  %p3092_p8 = scmp.lt.s32.totalorder %s3668_s5, %s3090_s26 }
  0x4e   : > { %2689 = vmatpush3.bf16.msra.mxu0 %v2934_v1  ;;  %2839 = vmatpush3.bf16.msra.mxu1 %v2934_v1  ;;  %v2948_v15 = vld [vmem:[%s3330_s7 + $0x118] sm:$0xff]   ;;  %v2950_v17 = vld [vmem:[%s3330_s7 + $0x120] sm:$0xff]   ;;  %v2952_v19 = vld [vmem:[%s3330_s7 + $0x128] sm:$0xff]   ;;  %p3087_p4 = pnand %p3086_p1, %p3296_p5  ;;  %p3093_p0 = scmp.lt.s32.totalorder %s3091_s19, %s3085_s21 }
  0x4f   : > { %2690 = vmatprep.subr.bf16.mxu0 %v2935_v2  ;;  %2832 = vmatprep.subr.bf16.mxu1 %v2935_v2  ;;  %v2953_v20 = vld [vmem:[%s3330_s7 + $0x30] sm:$0xff]   ;;  %v2955_v22 = vld [vmem:[%s3330_s7 + $0x38] sm:$0xff]   ;;  %v2957_v24 = vld [vmem:[%s3330_s7 + $0x40] sm:$0xff]  }
  0x50   : > { %v2954_v21 = vld [vmem:[%s3330_s7 + $0x130] sm:$0xff]   ;;  %v2956_v23 = vld [vmem:[%s3330_s7 + $0x138] sm:$0xff]   ;;  %v2958_v25 = vld [vmem:[%s3330_s7 + $0x140] sm:$0xff]   ;;  %p3088_p6 = pneg %p3087_p4  ;;  %p3094_p10 = por %p3093_p0, %p3092_p8 }
  0x51   : > { %v2959_v26 = vld [vmem:[%s3330_s7 + $0x48] sm:$0xff]   ;;  %v2961_v28 = vld [vmem:[%s3330_s7 + $0x50] sm:$0xff]   ;;  %v2963_v30 = vld [vmem:[%s3330_s7 + $0x58] sm:$0xff]  }
  0x52   : > { %2691 = vmatpush3.bf16.msra.mxu0 %v2935_v2  ;;  %2840 = vmatpush3.bf16.msra.mxu1 %v2935_v2  ;;  %v2960_v27 = vld [vmem:[%s3330_s7 + $0x148] sm:$0xff]   ;;  %v2962_v29 = vld [vmem:[%s3330_s7 + $0x150] sm:$0xff]   ;;  %v2964_v31 = vld [vmem:[%s3330_s7 + $0x158] sm:$0xff]   ;;  %p3095_p2 = pnand %p3094_p10, %p3088_p6 }
  0x53   : > { %2692 = vmatprep.subr.bf16.mxu0 %v2936_v3  ;;  %2833 = vmatprep.subr.bf16.mxu1 %v2936_v3  ;;  %v2965_v32 = vld [vmem:[%s3330_s7 + $0x60] sm:$0xff]   ;;  %v2967_v34 = vld [vmem:[%s3330_s7 + $0x68] sm:$0xff]   ;;  %v2969_v36 = vld [vmem:[%s3330_s7 + $0x70] sm:$0xff]  }
  0x54   : > { %v2966_v33 = vld [vmem:[%s3330_s7 + $0x160] sm:$0xff]   ;;  %v2968_v35 = vld [vmem:[%s3330_s7 + $0x168] sm:$0xff]   ;;  %v2970_v37 = vld [vmem:[%s3330_s7 + $0x170] sm:$0xff]  }
  0x55   : > { %v2971_v38 = vld [vmem:[%s3330_s7 + $0x78] sm:$0xff]   ;;  %v2973_v40 = vld [vmem:[%s3330_s7 + $0x80] sm:$0xff]   ;;  %v2975_v42 = vld [vmem:[%s3330_s7 + $0x88] sm:$0xff]  }
  0x56   : > { %2693 = vmatpush3.bf16.msra.mxu0 %v2936_v3  ;;  %2841 = vmatpush3.bf16.msra.mxu1 %v2936_v3  ;;  %v2972_v39 = vld [vmem:[%s3330_s7 + $0x178] sm:$0xff]   ;;  %v2974_v41 = vld [vmem:[%s3330_s7 + $0x180] sm:$0xff]   ;;  %v2976_v43 = vld [vmem:[%s3330_s7 + $0x188] sm:$0xff]  }
  0x57   : > { %2694 = vmatprep.subr.bf16.mxu0 %v2937_v6  ;;  %2834 = vmatprep.subr.bf16.mxu1 %v2937_v6  ;;  %v2977_v44 = vld [vmem:[%s3330_s7 + $0x90] sm:$0xff]   ;;  %v2979_v46 = vld [vmem:[%s3330_s7 + $0x98] sm:$0xff]   ;;  %v2981_v48 = vld [vmem:[%s3330_s7 + $0xa0] sm:$0xff]  }
  0x58   : > { %v2978_v45 = vld [vmem:[%s3330_s7 + $0x190] sm:$0xff]   ;;  %v2980_v47 = vld [vmem:[%s3330_s7 + $0x198] sm:$0xff]   ;;  %v2982_v49 = vld [vmem:[%s3330_s7 + $0x1a0] sm:$0xff]  }
  0x59   : > { %v2983_v50 = vld [vmem:[%s3330_s7 + $0xa8] sm:$0xff]   ;;  %v2985_v52 = vld [vmem:[%s3330_s7 + $0xb0] sm:$0xff]   ;;  %v2987_v54 = vld [vmem:[%s3330_s7 + $0xb8] sm:$0xff]  }
  0x5a   : > { %2695 = vmatpush3.bf16.msra.mxu0 %v2937_v6  ;;  %2842 = vmatpush3.bf16.msra.mxu1 %v2937_v6  ;;  %v2984_v51 = vld [vmem:[%s3330_s7 + $0x1a8] sm:$0xff]   ;;  %v2986_v53 = vld [vmem:[%s3330_s7 + $0x1b0] sm:$0xff]   ;;  %v2988_v55 = vld [vmem:[%s3330_s7 + $0x1b8] sm:$0xff]  }
  0x5b   : > { %2696 = vmatprep.subr.bf16.mxu0 %v2938_v7  ;;  %2835 = vmatprep.subr.bf16.mxu1 %v2938_v7  ;;  %v2989_v56 = vld [vmem:[%s3330_s7 + $0xc0] sm:$0xff]   ;;  %v2991_v58 = vld [vmem:[%s3330_s7 + $0xc8] sm:$0xff]   ;;  %v2993_v60 = vld [vmem:[%s3330_s7 + $0xd0] sm:$0xff]  }
  0x5c   : > { %v2990_v57 = vld [vmem:[%s3330_s7 + $0x1c0] sm:$0xff]   ;;  %v2992_v59 = vld [vmem:[%s3330_s7 + $0x1c8] sm:$0xff]   ;;  %v2994_v61 = vld [vmem:[%s3330_s7 + $0x1d0] sm:$0xff]  }
  0x5d   : > { %v2995_v62 = vld [vmem:[%s3330_s7 + $0xd8] sm:$0xff]   ;;  %v2997_v0 = vld [vmem:[%s3330_s7 + $0xe0] sm:$0xff]   ;;  %v2999_v2 = vld [vmem:[%s3330_s7 + $0xe8] sm:$0xff]  }
  0x5e   : > { %2697 = vmatpush3.bf16.msra.mxu0 %v2938_v7  ;;  %2843 = vmatpush3.bf16.msra.mxu1 %v2938_v7  ;;  %v2996_v63 = vld [vmem:[%s3330_s7 + $0x1d8] sm:$0xff]   ;;  %v2998_v1 = vld [vmem:[%s3330_s7 + $0x1e0] sm:$0xff]   ;;  %v3000_v3 = vld [vmem:[%s3330_s7 + $0x1e8] sm:$0xff]  }
  0x5f   : > { %2698 = vmatprep.subr.bf16.mxu0 %v2939_v8  ;;  %2836 = vmatprep.subr.bf16.mxu1 %v2939_v8  ;;  %v3001_v4 = vld [vmem:[%s3330_s7 + $0xf0] sm:$0xff]   ;;  %v3003_v6 = vld [vmem:[%s3330_s7 + $0xf8] sm:$0xff]  }
  0x60   : > { %v3002_v5 = vld [vmem:[%s3330_s7 + $0x1f0] sm:$0xff]   ;;  %v3004_v7 = vld [vmem:[%s3330_s7 + $0x1f8] sm:$0xff]  }
  0x62   : > { %2699 = vmatpush3.bf16.msra.mxu0 %v2939_v8  ;;  %2844 = vmatpush3.bf16.msra.mxu1 %v2939_v8  ;;  %v3404_v8 = vld [vmem:[#allocation8] ss:$0 sm:$0xff] }
  0x63   : > { %2700 = vmatprep.subr.bf16.mxu0 %v2940_v9  ;;  %2837 = vmatprep.subr.bf16.mxu1 %v2940_v9 }
  0x66   : > { %2701 = vmatpush3.bf16.msra.mxu0 %v2940_v9  ;;  %2845 = vmatpush3.bf16.msra.mxu1 %v2940_v9 }
  0x69   : > { %2703 = vmatmul.mubr.bf16.vlgmr.msra.gmra.mxu0 %v2943_v10  ;;  %2767 = vmatmul.mubr.bf16.vlgmr.msra.gmra.mxu1 %v2944_v11 }
  0x6a   : > { %2706 = vmatprep.mubr.bf16.mxu0 %v2945_v12  ;;  %2770 = vmatprep.mubr.bf16.mxu1 %v2946_v13 }
  0x71   : > { %2707 = vmatmul.mubr.bf16.gmra.mxu0 %v2947_v14  ;;  %2771 = vmatmul.mubr.bf16.gmra.mxu1 %v2948_v15 }
  0x72   : > { %2710 = vmatprep.mubr.bf16.mxu0 %v2949_v16  ;;  %2774 = vmatprep.mubr.bf16.mxu1 %v2950_v17 }
  0x79   : > { %2711 = vmatmul.mubr.bf16.gmra.mxu0 %v2951_v18  ;;  %2775 = vmatmul.mubr.bf16.gmra.mxu1 %v2952_v19 }
  0x7a   : > { %2714 = vmatprep.mubr.bf16.mxu0 %v2953_v20  ;;  %2778 = vmatprep.mubr.bf16.mxu1 %v2954_v21 }
  0x81   : > { %2715 = vmatmul.mubr.bf16.gmra.mxu0 %v2955_v22  ;;  %2779 = vmatmul.mubr.bf16.gmra.mxu1 %v2956_v23 }
  0x82   : > { %2718 = vmatprep.mubr.bf16.mxu0 %v2957_v24  ;;  %2782 = vmatprep.mubr.bf16.mxu1 %v2958_v25 }
  0x89   : > { %2719 = vmatmul.mubr.bf16.gmra.mxu0 %v2959_v26  ;;  %2783 = vmatmul.mubr.bf16.gmra.mxu1 %v2960_v27 }
  0x8a   : > { %2722 = vmatprep.mubr.bf16.mxu0 %v2961_v28  ;;  %2786 = vmatprep.mubr.bf16.mxu1 %v2962_v29 }
  0x91   : > { %2723 = vmatmul.mubr.bf16.gmra.mxu0 %v2963_v30  ;;  %2787 = vmatmul.mubr.bf16.gmra.mxu1 %v2964_v31 }
  0x92   : > { %2726 = vmatprep.mubr.bf16.mxu0 %v2965_v32  ;;  %2790 = vmatprep.mubr.bf16.mxu1 %v2966_v33 }
  0x99   : > { %2727 = vmatmul.mubr.bf16.gmra.mxu0 %v2967_v34  ;;  %2791 = vmatmul.mubr.bf16.gmra.mxu1 %v2968_v35 }
  0x9a   : > { %2730 = vmatprep.mubr.bf16.mxu0 %v2969_v36  ;;  %2794 = vmatprep.mubr.bf16.mxu1 %v2970_v37 }
  0xa1   : > { %2731 = vmatmul.mubr.bf16.gmra.mxu0 %v2971_v38  ;;  %2795 = vmatmul.mubr.bf16.gmra.mxu1 %v2972_v39 }
  0xa2   : > { %2734 = vmatprep.mubr.bf16.mxu0 %v2973_v40  ;;  %2798 = vmatprep.mubr.bf16.mxu1 %v2974_v41 }
  0xa9   : > { %2735 = vmatmul.mubr.bf16.gmra.mxu0 %v2975_v42  ;;  %2799 = vmatmul.mubr.bf16.gmra.mxu1 %v2976_v43 }
  0xaa   : > { %2738 = vmatprep.mubr.bf16.mxu0 %v2977_v44  ;;  %2802 = vmatprep.mubr.bf16.mxu1 %v2978_v45 }
  0xb1   : > { %2739 = vmatmul.mubr.bf16.gmra.mxu0 %v2979_v46  ;;  %2803 = vmatmul.mubr.bf16.gmra.mxu1 %v2980_v47 }
  0xb2   : > { %2742 = vmatprep.mubr.bf16.mxu0 %v2981_v48  ;;  %2806 = vmatprep.mubr.bf16.mxu1 %v2982_v49 }
  0xb9   : > { %2743 = vmatmul.mubr.bf16.gmra.mxu0 %v2983_v50  ;;  %2807 = vmatmul.mubr.bf16.gmra.mxu1 %v2984_v51 }
  0xba   : > { %2746 = vmatprep.mubr.bf16.mxu0 %v2985_v52  ;;  %2810 = vmatprep.mubr.bf16.mxu1 %v2986_v53 }
  0xc1   : > { %2747 = vmatmul.mubr.bf16.gmra.mxu0 %v2987_v54  ;;  %2811 = vmatmul.mubr.bf16.gmra.mxu1 %v2988_v55 }
  0xc2   : > { %2750 = vmatprep.mubr.bf16.mxu0 %v2989_v56  ;;  %2814 = vmatprep.mubr.bf16.mxu1 %v2990_v57 }
  0xc9   : > { %2751 = vmatmul.mubr.bf16.gmra.mxu0 %v2991_v58  ;;  %2815 = vmatmul.mubr.bf16.gmra.mxu1 %v2992_v59 }
  0xca   : > { %2754 = vmatprep.mubr.bf16.mxu0 %v2993_v60  ;;  %2818 = vmatprep.mubr.bf16.mxu1 %v2994_v61 }
  0xd1   : > { %2755 = vmatmul.mubr.bf16.gmra.mxu0 %v2995_v62  ;;  %2819 = vmatmul.mubr.bf16.gmra.mxu1 %v2996_v63 }
  0xd2   : > { %2758 = vmatprep.mubr.bf16.mxu0 %v2997_v0  ;;  %2822 = vmatprep.mubr.bf16.mxu1 %v2998_v1 }
  0xd9   : > { %2759 = vmatmul.mubr.bf16.gmra.mxu0 %v2999_v2  ;;  %2823 = vmatmul.mubr.bf16.gmra.mxu1 %v3000_v3 }
  0xda   : > { %2762 = vmatprep.mubr.bf16.mxu0 %v3001_v4  ;;  %2826 = vmatprep.mubr.bf16.mxu1 %v3002_v5 }
  0xe1   : > { %2763 = vmatmul.mubr.bf16.gmra.mxu0 %v3003_v6  ;;  %2827 = vmatmul.mubr.bf16.gmra.mxu1 %v3004_v7 }
 0x129   : > { %v2704_v9 = vpop.f32.mrf.mxu0  ;;  %v2768_v10 = vpop.f32.mrf.mxu1 }
 0x12a   : > { %v2020_v11 = vadd.f32 %v2704_v9, %v3404_v8  ;;  %v2084_v12 = vadd.f32 %v2768_v10, %v3404_v8 }
 0x12b   : > { %v1113_v13 = vpop.f32.mrf.mxu0  ;;  %v1369_v14 = vpop.f32.mrf.mxu1 }
 0x12c   : > { %v2148_v15 = vmax.f32 %v2020_v11, 0.0  ;;  %v2212_v16 = vmax.f32 %v2084_v12, 0.0  ;;  %v2018_v17 = vadd.f32 %v3404_v8, %v1113_v13  ;;  %v2082_v18 = vadd.f32 %v3404_v8, %v1369_v14 }
 0x12d   : > { %v2705_v19 = vpop.f32.mrf.mxu0  ;;  %v2769_v20 = vpop.f32.mrf.mxu1 }
 0x12e   : > { %2276 = vst [vmem:[%s3411_s22 + $0x10] sm:$0xff] %v2148_v15  ;;  %2340 = vst [vmem:[%s3411_s22 + $0x210] sm:$0xff] %v2212_v16  ;;  %v2146_v21 = vmax.f32 %v2018_v17, 0.0  ;;  %v2210_v22 = vmax.f32 %v2082_v18, 0.0  ;;  %v2021_v23 = vadd.f32 %v2705_v19, %v3404_v8  ;;  %v2085_v24 = vadd.f32 %v2769_v20, %v3404_v8 }
 0x12f   : > { %v1116_v25 = vpop.f32.mrf.mxu0  ;;  %v1372_v26 = vpop.f32.mrf.mxu1 }
 0x130   : > { %2274 = vst [vmem:[%s3411_s22] sm:$0xff] %v2146_v21  ;;  %2338 = vst [vmem:[%s3411_s22 + $0x200] sm:$0xff] %v2210_v22  ;;  %v2149_v27 = vmax.f32 %v2021_v23, 0.0  ;;  %v2213_v28 = vmax.f32 %v2085_v24, 0.0  ;;  %v2019_v29 = vadd.f32 %v3404_v8, %v1116_v25  ;;  %v2083_v30 = vadd.f32 %v3404_v8, %v1372_v26 }
 0x131   : > { %v2708_v31 = vpop.f32.mrf.mxu0  ;;  %v2772_v32 = vpop.f32.mrf.mxu1 }
 0x132   : > { %2277 = vst [vmem:[%s3411_s22 + $0x18] sm:$0xff] %v2149_v27  ;;  %2341 = vst [vmem:[%s3411_s22 + $0x218] sm:$0xff] %v2213_v28  ;;  %v2147_v33 = vmax.f32 %v2019_v29, 0.0  ;;  %v2211_v34 = vmax.f32 %v2083_v30, 0.0  ;;  %v2024_v35 = vadd.f32 %v2708_v31, %v3404_v8  ;;  %v2088_v36 = vadd.f32 %v2772_v32, %v3404_v8 }
 0x133   : > { %v1129_v37 = vpop.f32.mrf.mxu0  ;;  %v1385_v38 = vpop.f32.mrf.mxu1 }
 0x134   : > { %2275 = vst [vmem:[%s3411_s22 + $0x8] sm:$0xff] %v2147_v33  ;;  %2339 = vst [vmem:[%s3411_s22 + $0x208] sm:$0xff] %v2211_v34  ;;  %v2152_v39 = vmax.f32 %v2024_v35, 0.0  ;;  %v2216_v40 = vmax.f32 %v2088_v36, 0.0  ;;  %v2022_v41 = vadd.f32 %v3404_v8, %v1129_v37  ;;  %v2086_v42 = vadd.f32 %v3404_v8, %v1385_v38 }
 0x135   : > { %v2709_v43 = vpop.f32.mrf.mxu0  ;;  %v2773_v44 = vpop.f32.mrf.mxu1 }
 0x136   : > { %2280 = vst [vmem:[%s3411_s22 + $0x30] sm:$0xff] %v2152_v39  ;;  %2344 = vst [vmem:[%s3411_s22 + $0x230] sm:$0xff] %v2216_v40  ;;  %v2150_v45 = vmax.f32 %v2022_v41, 0.0  ;;  %v2214_v46 = vmax.f32 %v2086_v42, 0.0  ;;  %v2025_v47 = vadd.f32 %v2709_v43, %v3404_v8  ;;  %v2089_v48 = vadd.f32 %v2773_v44, %v3404_v8 }
 0x137   : > { %v1132_v49 = vpop.f32.mrf.mxu0  ;;  %v1388_v50 = vpop.f32.mrf.mxu1 }
 0x138   : > { %2278 = vst [vmem:[%s3411_s22 + $0x20] sm:$0xff] %v2150_v45  ;;  %2342 = vst [vmem:[%s3411_s22 + $0x220] sm:$0xff] %v2214_v46  ;;  %v2153_v51 = vmax.f32 %v2025_v47, 0.0  ;;  %v2217_v52 = vmax.f32 %v2089_v48, 0.0  ;;  %v2023_v53 = vadd.f32 %v3404_v8, %v1132_v49  ;;  %v2087_v54 = vadd.f32 %v3404_v8, %v1388_v50 }
 0x139   : > { %v2712_v55 = vpop.f32.mrf.mxu0  ;;  %v2776_v56 = vpop.f32.mrf.mxu1 }
 0x13a   : > { %2281 = vst [vmem:[%s3411_s22 + $0x38] sm:$0xff] %v2153_v51  ;;  %2345 = vst [vmem:[%s3411_s22 + $0x238] sm:$0xff] %v2217_v52  ;;  %v2151_v57 = vmax.f32 %v2023_v53, 0.0  ;;  %v2215_v58 = vmax.f32 %v2087_v54, 0.0  ;;  %v2028_v59 = vadd.f32 %v2712_v55, %v3404_v8  ;;  %v2092_v60 = vadd.f32 %v2776_v56, %v3404_v8 }
 0x13b   : > { %v1145_v61 = vpop.f32.mrf.mxu0  ;;  %v1401_v62 = vpop.f32.mrf.mxu1 }
 0x13c   : > { %2279 = vst [vmem:[%s3411_s22 + $0x28] sm:$0xff] %v2151_v57  ;;  %2343 = vst [vmem:[%s3411_s22 + $0x228] sm:$0xff] %v2215_v58  ;;  %v2156_v63 = vmax.f32 %v2028_v59, 0.0  ;;  %v2220_v0 = vmax.f32 %v2092_v60, 0.0  ;;  %v2026_v1 = vadd.f32 %v3404_v8, %v1145_v61  ;;  %v2090_v2 = vadd.f32 %v3404_v8, %v1401_v62 }
 0x13d   : > { %v2713_v3 = vpop.f32.mrf.mxu0  ;;  %v2777_v4 = vpop.f32.mrf.mxu1 }
 0x13e   : > { %2284 = vst [vmem:[%s3411_s22 + $0x50] sm:$0xff] %v2156_v63  ;;  %2348 = vst [vmem:[%s3411_s22 + $0x250] sm:$0xff] %v2220_v0  ;;  %v2154_v5 = vmax.f32 %v2026_v1, 0.0  ;;  %v2218_v6 = vmax.f32 %v2090_v2, 0.0  ;;  %v2029_v7 = vadd.f32 %v2713_v3, %v3404_v8  ;;  %v2093_v9 = vadd.f32 %v2777_v4, %v3404_v8 }
 0x13f   : > { %v1148_v10 = vpop.f32.mrf.mxu0  ;;  %v1404_v11 = vpop.f32.mrf.mxu1 }
 0x140   : > { %2282 = vst [vmem:[%s3411_s22 + $0x40] sm:$0xff] %v2154_v5  ;;  %2346 = vst [vmem:[%s3411_s22 + $0x240] sm:$0xff] %v2218_v6  ;;  %v2157_v12 = vmax.f32 %v2029_v7, 0.0  ;;  %v2221_v13 = vmax.f32 %v2093_v9, 0.0  ;;  %v2027_v14 = vadd.f32 %v3404_v8, %v1148_v10  ;;  %v2091_v15 = vadd.f32 %v3404_v8, %v1404_v11 }
 0x141   : > { %v2716_v16 = vpop.f32.mrf.mxu0  ;;  %v2780_v17 = vpop.f32.mrf.mxu1 }
 0x142   : > { %2285 = vst [vmem:[%s3411_s22 + $0x58] sm:$0xff] %v2157_v12  ;;  %2349 = vst [vmem:[%s3411_s22 + $0x258] sm:$0xff] %v2221_v13  ;;  %v2155_v18 = vmax.f32 %v2027_v14, 0.0  ;;  %v2219_v19 = vmax.f32 %v2091_v15, 0.0  ;;  %v2032_v20 = vadd.f32 %v2716_v16, %v3404_v8  ;;  %v2096_v21 = vadd.f32 %v2780_v17, %v3404_v8 }
 0x143   : > { %v1161_v22 = vpop.f32.mrf.mxu0  ;;  %v1417_v23 = vpop.f32.mrf.mxu1 }
 0x144   : > { %2283 = vst [vmem:[%s3411_s22 + $0x48] sm:$0xff] %v2155_v18  ;;  %2347 = vst [vmem:[%s3411_s22 + $0x248] sm:$0xff] %v2219_v19  ;;  %v2160_v24 = vmax.f32 %v2032_v20, 0.0  ;;  %v2224_v25 = vmax.f32 %v2096_v21, 0.0  ;;  %v2030_v26 = vadd.f32 %v3404_v8, %v1161_v22  ;;  %v2094_v27 = vadd.f32 %v3404_v8, %v1417_v23 }
 0x145   : > { %v2717_v28 = vpop.f32.mrf.mxu0  ;;  %v2781_v29 = vpop.f32.mrf.mxu1 }
 0x146   : > { %2288 = vst [vmem:[%s3411_s22 + $0x70] sm:$0xff] %v2160_v24  ;;  %2352 = vst [vmem:[%s3411_s22 + $0x270] sm:$0xff] %v2224_v25  ;;  %v2158_v30 = vmax.f32 %v2030_v26, 0.0  ;;  %v2222_v31 = vmax.f32 %v2094_v27, 0.0  ;;  %v2033_v32 = vadd.f32 %v2717_v28, %v3404_v8  ;;  %v2097_v33 = vadd.f32 %v2781_v29, %v3404_v8 }
 0x147   : > { %v1164_v34 = vpop.f32.mrf.mxu0  ;;  %v1420_v35 = vpop.f32.mrf.mxu1 }
 0x148   : > { %2286 = vst [vmem:[%s3411_s22 + $0x60] sm:$0xff] %v2158_v30  ;;  %2350 = vst [vmem:[%s3411_s22 + $0x260] sm:$0xff] %v2222_v31  ;;  %v2161_v36 = vmax.f32 %v2033_v32, 0.0  ;;  %v2225_v37 = vmax.f32 %v2097_v33, 0.0  ;;  %v2031_v38 = vadd.f32 %v3404_v8, %v1164_v34  ;;  %v2095_v39 = vadd.f32 %v3404_v8, %v1420_v35 }
 0x149   : > { %v2720_v40 = vpop.f32.mrf.mxu0  ;;  %v2784_v41 = vpop.f32.mrf.mxu1 }
 0x14a   : > { %2289 = vst [vmem:[%s3411_s22 + $0x78] sm:$0xff] %v2161_v36  ;;  %2353 = vst [vmem:[%s3411_s22 + $0x278] sm:$0xff] %v2225_v37  ;;  %v2159_v42 = vmax.f32 %v2031_v38, 0.0  ;;  %v2223_v43 = vmax.f32 %v2095_v39, 0.0  ;;  %v2036_v44 = vadd.f32 %v2720_v40, %v3404_v8  ;;  %v2100_v45 = vadd.f32 %v2784_v41, %v3404_v8 }
 0x14b   : > { %v1177_v46 = vpop.f32.mrf.mxu0  ;;  %v1433_v47 = vpop.f32.mrf.mxu1 }
 0x14c   : > { %2287 = vst [vmem:[%s3411_s22 + $0x68] sm:$0xff] %v2159_v42  ;;  %2351 = vst [vmem:[%s3411_s22 + $0x268] sm:$0xff] %v2223_v43  ;;  %v2164_v48 = vmax.f32 %v2036_v44, 0.0  ;;  %v2228_v49 = vmax.f32 %v2100_v45, 0.0  ;;  %v2034_v50 = vadd.f32 %v3404_v8, %v1177_v46  ;;  %v2098_v51 = vadd.f32 %v3404_v8, %v1433_v47 }
 0x14d   : > { %v2721_v52 = vpop.f32.mrf.mxu0  ;;  %v2785_v53 = vpop.f32.mrf.mxu1 }
 0x14e   : > { %2292 = vst [vmem:[%s3411_s22 + $0x90] sm:$0xff] %v2164_v48  ;;  %2356 = vst [vmem:[%s3411_s22 + $0x290] sm:$0xff] %v2228_v49  ;;  %v2162_v54 = vmax.f32 %v2034_v50, 0.0  ;;  %v2226_v55 = vmax.f32 %v2098_v51, 0.0  ;;  %v2037_v56 = vadd.f32 %v2721_v52, %v3404_v8  ;;  %v2101_v57 = vadd.f32 %v2785_v53, %v3404_v8 }
 0x14f   : > { %v1180_v58 = vpop.f32.mrf.mxu0  ;;  %v1436_v59 = vpop.f32.mrf.mxu1 }
 0x150   : > { %2290 = vst [vmem:[%s3411_s22 + $0x80] sm:$0xff] %v2162_v54  ;;  %2354 = vst [vmem:[%s3411_s22 + $0x280] sm:$0xff] %v2226_v55  ;;  %v2165_v60 = vmax.f32 %v2037_v56, 0.0  ;;  %v2229_v61 = vmax.f32 %v2101_v57, 0.0  ;;  %v2035_v62 = vadd.f32 %v3404_v8, %v1180_v58  ;;  %v2099_v63 = vadd.f32 %v3404_v8, %v1436_v59 }
 0x151   : > { %v2724_v0 = vpop.f32.mrf.mxu0  ;;  %v2788_v1 = vpop.f32.mrf.mxu1 }
 0x152   : > { %2293 = vst [vmem:[%s3411_s22 + $0x98] sm:$0xff] %v2165_v60  ;;  %2357 = vst [vmem:[%s3411_s22 + $0x298] sm:$0xff] %v2229_v61  ;;  %v2163_v2 = vmax.f32 %v2035_v62, 0.0  ;;  %v2227_v3 = vmax.f32 %v2099_v63, 0.0  ;;  %v2040_v4 = vadd.f32 %v2724_v0, %v3404_v8  ;;  %v2104_v5 = vadd.f32 %v2788_v1, %v3404_v8 }
 0x153   : > { %v1193_v6 = vpop.f32.mrf.mxu0  ;;  %v1449_v7 = vpop.f32.mrf.mxu1 }
 0x154   : > { %2291 = vst [vmem:[%s3411_s22 + $0x88] sm:$0xff] %v2163_v2  ;;  %2355 = vst [vmem:[%s3411_s22 + $0x288] sm:$0xff] %v2227_v3  ;;  %v2168_v9 = vmax.f32 %v2040_v4, 0.0  ;;  %v2232_v10 = vmax.f32 %v2104_v5, 0.0  ;;  %v2038_v11 = vadd.f32 %v3404_v8, %v1193_v6  ;;  %v2102_v12 = vadd.f32 %v3404_v8, %v1449_v7 }
 0x155   : > { %v2725_v13 = vpop.f32.mrf.mxu0  ;;  %v2789_v14 = vpop.f32.mrf.mxu1 }
 0x156   : > { %2296 = vst [vmem:[%s3411_s22 + $0xb0] sm:$0xff] %v2168_v9  ;;  %2360 = vst [vmem:[%s3411_s22 + $0x2b0] sm:$0xff] %v2232_v10  ;;  %v2166_v15 = vmax.f32 %v2038_v11, 0.0  ;;  %v2230_v16 = vmax.f32 %v2102_v12, 0.0  ;;  %v2041_v17 = vadd.f32 %v2725_v13, %v3404_v8  ;;  %v2105_v18 = vadd.f32 %v2789_v14, %v3404_v8 }
 0x157   : > { %v1196_v19 = vpop.f32.mrf.mxu0  ;;  %v1452_v20 = vpop.f32.mrf.mxu1 }
 0x158   : > { %2294 = vst [vmem:[%s3411_s22 + $0xa0] sm:$0xff] %v2166_v15  ;;  %2358 = vst [vmem:[%s3411_s22 + $0x2a0] sm:$0xff] %v2230_v16  ;;  %v2169_v21 = vmax.f32 %v2041_v17, 0.0  ;;  %v2233_v22 = vmax.f32 %v2105_v18, 0.0  ;;  %v2039_v23 = vadd.f32 %v3404_v8, %v1196_v19  ;;  %v2103_v24 = vadd.f32 %v3404_v8, %v1452_v20 }
 0x159   : > { %v2728_v25 = vpop.f32.mrf.mxu0  ;;  %v2792_v26 = vpop.f32.mrf.mxu1 }
 0x15a   : > { %2297 = vst [vmem:[%s3411_s22 + $0xb8] sm:$0xff] %v2169_v21  ;;  %2361 = vst [vmem:[%s3411_s22 + $0x2b8] sm:$0xff] %v2233_v22  ;;  %v2167_v27 = vmax.f32 %v2039_v23, 0.0  ;;  %v2231_v28 = vmax.f32 %v2103_v24, 0.0  ;;  %v2044_v29 = vadd.f32 %v2728_v25, %v3404_v8  ;;  %v2108_v30 = vadd.f32 %v2792_v26, %v3404_v8 }
 0x15b   : > { %v1209_v31 = vpop.f32.mrf.mxu0  ;;  %v1465_v32 = vpop.f32.mrf.mxu1 }
 0x15c   : > { %2295 = vst [vmem:[%s3411_s22 + $0xa8] sm:$0xff] %v2167_v27  ;;  %2359 = vst [vmem:[%s3411_s22 + $0x2a8] sm:$0xff] %v2231_v28  ;;  %v2172_v33 = vmax.f32 %v2044_v29, 0.0  ;;  %v2236_v34 = vmax.f32 %v2108_v30, 0.0  ;;  %v2042_v35 = vadd.f32 %v3404_v8, %v1209_v31  ;;  %v2106_v36 = vadd.f32 %v3404_v8, %v1465_v32 }
 0x15d   : > { %v2729_v37 = vpop.f32.mrf.mxu0  ;;  %v2793_v38 = vpop.f32.mrf.mxu1 }
 0x15e   : > { %2300 = vst [vmem:[%s3411_s22 + $0xd0] sm:$0xff] %v2172_v33  ;;  %2364 = vst [vmem:[%s3411_s22 + $0x2d0] sm:$0xff] %v2236_v34  ;;  %v2170_v39 = vmax.f32 %v2042_v35, 0.0  ;;  %v2234_v40 = vmax.f32 %v2106_v36, 0.0  ;;  %v2045_v41 = vadd.f32 %v2729_v37, %v3404_v8  ;;  %v2109_v42 = vadd.f32 %v2793_v38, %v3404_v8 }
 0x15f   : > { %v1212_v43 = vpop.f32.mrf.mxu0  ;;  %v1468_v44 = vpop.f32.mrf.mxu1 }
 0x160   : > { %2298 = vst [vmem:[%s3411_s22 + $0xc0] sm:$0xff] %v2170_v39  ;;  %2362 = vst [vmem:[%s3411_s22 + $0x2c0] sm:$0xff] %v2234_v40  ;;  %v2173_v45 = vmax.f32 %v2045_v41, 0.0  ;;  %v2237_v46 = vmax.f32 %v2109_v42, 0.0  ;;  %v2043_v47 = vadd.f32 %v3404_v8, %v1212_v43  ;;  %v2107_v48 = vadd.f32 %v3404_v8, %v1468_v44 }
 0x161   : > { %v2732_v49 = vpop.f32.mrf.mxu0  ;;  %v2796_v50 = vpop.f32.mrf.mxu1 }
 0x162   : > { %2301 = vst [vmem:[%s3411_s22 + $0xd8] sm:$0xff] %v2173_v45  ;;  %2365 = vst [vmem:[%s3411_s22 + $0x2d8] sm:$0xff] %v2237_v46  ;;  %v2171_v51 = vmax.f32 %v2043_v47, 0.0  ;;  %v2235_v52 = vmax.f32 %v2107_v48, 0.0  ;;  %v2048_v53 = vadd.f32 %v2732_v49, %v3404_v8  ;;  %v2112_v54 = vadd.f32 %v2796_v50, %v3404_v8 }
 0x163   : > { %v1225_v55 = vpop.f32.mrf.mxu0  ;;  %v1481_v56 = vpop.f32.mrf.mxu1 }
 0x164   : > { %2299 = vst [vmem:[%s3411_s22 + $0xc8] sm:$0xff] %v2171_v51  ;;  %2363 = vst [vmem:[%s3411_s22 + $0x2c8] sm:$0xff] %v2235_v52  ;;  %v2176_v57 = vmax.f32 %v2048_v53, 0.0  ;;  %v2240_v58 = vmax.f32 %v2112_v54, 0.0  ;;  %v2046_v59 = vadd.f32 %v3404_v8, %v1225_v55  ;;  %v2110_v60 = vadd.f32 %v3404_v8, %v1481_v56 }
 0x165   : > { %v2733_v61 = vpop.f32.mrf.mxu0  ;;  %v2797_v62 = vpop.f32.mrf.mxu1 }
 0x166   : > { %2304 = vst [vmem:[%s3411_s22 + $0xf0] sm:$0xff] %v2176_v57  ;;  %2368 = vst [vmem:[%s3411_s22 + $0x2f0] sm:$0xff] %v2240_v58  ;;  %v2174_v63 = vmax.f32 %v2046_v59, 0.0  ;;  %v2238_v0 = vmax.f32 %v2110_v60, 0.0  ;;  %v2049_v1 = vadd.f32 %v2733_v61, %v3404_v8  ;;  %v2113_v2 = vadd.f32 %v2797_v62, %v3404_v8 }
 0x167   : > { %v1228_v3 = vpop.f32.mrf.mxu0  ;;  %v1484_v4 = vpop.f32.mrf.mxu1 }
 0x168   : > { %2302 = vst [vmem:[%s3411_s22 + $0xe0] sm:$0xff] %v2174_v63  ;;  %2366 = vst [vmem:[%s3411_s22 + $0x2e0] sm:$0xff] %v2238_v0  ;;  %v2177_v5 = vmax.f32 %v2049_v1, 0.0  ;;  %v2241_v6 = vmax.f32 %v2113_v2, 0.0  ;;  %v2047_v7 = vadd.f32 %v3404_v8, %v1228_v3  ;;  %v2111_v9 = vadd.f32 %v3404_v8, %v1484_v4 }
 0x169   : > { %v2736_v10 = vpop.f32.mrf.mxu0  ;;  %v2800_v11 = vpop.f32.mrf.mxu1 }
 0x16a   : > { %2305 = vst [vmem:[%s3411_s22 + $0xf8] sm:$0xff] %v2177_v5  ;;  %2369 = vst [vmem:[%s3411_s22 + $0x2f8] sm:$0xff] %v2241_v6  ;;  %v2175_v12 = vmax.f32 %v2047_v7, 0.0  ;;  %v2239_v13 = vmax.f32 %v2111_v9, 0.0  ;;  %v2052_v14 = vadd.f32 %v2736_v10, %v3404_v8  ;;  %v2116_v15 = vadd.f32 %v2800_v11, %v3404_v8 }
 0x16b   : > { %v1241_v16 = vpop.f32.mrf.mxu0  ;;  %v1497_v17 = vpop.f32.mrf.mxu1 }
 0x16c   : > { %2303 = vst [vmem:[%s3411_s22 + $0xe8] sm:$0xff] %v2175_v12  ;;  %2367 = vst [vmem:[%s3411_s22 + $0x2e8] sm:$0xff] %v2239_v13  ;;  %v2180_v18 = vmax.f32 %v2052_v14, 0.0  ;;  %v2244_v19 = vmax.f32 %v2116_v15, 0.0  ;;  %v2050_v20 = vadd.f32 %v3404_v8, %v1241_v16  ;;  %v2114_v21 = vadd.f32 %v3404_v8, %v1497_v17 }
 0x16d   : > { %v2737_v22 = vpop.f32.mrf.mxu0  ;;  %v2801_v23 = vpop.f32.mrf.mxu1 }
 0x16e   : > { %2308 = vst [vmem:[%s3411_s22 + $0x110] sm:$0xff] %v2180_v18  ;;  %2372 = vst [vmem:[%s3411_s22 + $0x310] sm:$0xff] %v2244_v19  ;;  %v2178_v24 = vmax.f32 %v2050_v20, 0.0  ;;  %v2242_v25 = vmax.f32 %v2114_v21, 0.0  ;;  %v2053_v26 = vadd.f32 %v2737_v22, %v3404_v8  ;;  %v2117_v27 = vadd.f32 %v2801_v23, %v3404_v8 }
 0x16f   : > { %v1244_v28 = vpop.f32.mrf.mxu0  ;;  %v1500_v29 = vpop.f32.mrf.mxu1 }
 0x170   : > { %2306 = vst [vmem:[%s3411_s22 + $0x100] sm:$0xff] %v2178_v24  ;;  %2370 = vst [vmem:[%s3411_s22 + $0x300] sm:$0xff] %v2242_v25  ;;  %v2181_v30 = vmax.f32 %v2053_v26, 0.0  ;;  %v2245_v31 = vmax.f32 %v2117_v27, 0.0  ;;  %v2051_v32 = vadd.f32 %v3404_v8, %v1244_v28  ;;  %v2115_v33 = vadd.f32 %v3404_v8, %v1500_v29 }
 0x171   : > { %v2740_v34 = vpop.f32.mrf.mxu0  ;;  %v2804_v35 = vpop.f32.mrf.mxu1 }
 0x172   : > { %2309 = vst [vmem:[%s3411_s22 + $0x118] sm:$0xff] %v2181_v30  ;;  %2373 = vst [vmem:[%s3411_s22 + $0x318] sm:$0xff] %v2245_v31  ;;  %v2179_v36 = vmax.f32 %v2051_v32, 0.0  ;;  %v2243_v37 = vmax.f32 %v2115_v33, 0.0  ;;  %v2056_v38 = vadd.f32 %v2740_v34, %v3404_v8  ;;  %v2120_v39 = vadd.f32 %v2804_v35, %v3404_v8 }
 0x173   : > { %v1257_v40 = vpop.f32.mrf.mxu0  ;;  %v1513_v41 = vpop.f32.mrf.mxu1 }
 0x174   : > { %2307 = vst [vmem:[%s3411_s22 + $0x108] sm:$0xff] %v2179_v36  ;;  %2371 = vst [vmem:[%s3411_s22 + $0x308] sm:$0xff] %v2243_v37  ;;  %v2184_v42 = vmax.f32 %v2056_v38, 0.0  ;;  %v2248_v43 = vmax.f32 %v2120_v39, 0.0  ;;  %v2054_v44 = vadd.f32 %v3404_v8, %v1257_v40  ;;  %v2118_v45 = vadd.f32 %v3404_v8, %v1513_v41 }
 0x175   : > { %v2741_v46 = vpop.f32.mrf.mxu0  ;;  %v2805_v47 = vpop.f32.mrf.mxu1 }
 0x176   : > { %2312 = vst [vmem:[%s3411_s22 + $0x130] sm:$0xff] %v2184_v42  ;;  %2376 = vst [vmem:[%s3411_s22 + $0x330] sm:$0xff] %v2248_v43  ;;  %v2182_v48 = vmax.f32 %v2054_v44, 0.0  ;;  %v2246_v49 = vmax.f32 %v2118_v45, 0.0  ;;  %v2057_v50 = vadd.f32 %v2741_v46, %v3404_v8  ;;  %v2121_v51 = vadd.f32 %v2805_v47, %v3404_v8 }
 0x177   : > { %v1260_v52 = vpop.f32.mrf.mxu0  ;;  %v1516_v53 = vpop.f32.mrf.mxu1 }
 0x178   : > { %2310 = vst [vmem:[%s3411_s22 + $0x120] sm:$0xff] %v2182_v48  ;;  %2374 = vst [vmem:[%s3411_s22 + $0x320] sm:$0xff] %v2246_v49  ;;  %v2185_v54 = vmax.f32 %v2057_v50, 0.0  ;;  %v2249_v55 = vmax.f32 %v2121_v51, 0.0  ;;  %v2055_v56 = vadd.f32 %v3404_v8, %v1260_v52  ;;  %v2119_v57 = vadd.f32 %v3404_v8, %v1516_v53 }
 0x179   : > { %v2744_v58 = vpop.f32.mrf.mxu0  ;;  %v2808_v59 = vpop.f32.mrf.mxu1 }
 0x17a   : > { %2313 = vst [vmem:[%s3411_s22 + $0x138] sm:$0xff] %v2185_v54  ;;  %2377 = vst [vmem:[%s3411_s22 + $0x338] sm:$0xff] %v2249_v55  ;;  %v2183_v60 = vmax.f32 %v2055_v56, 0.0  ;;  %v2247_v61 = vmax.f32 %v2119_v57, 0.0  ;;  %v2060_v62 = vadd.f32 %v2744_v58, %v3404_v8  ;;  %v2124_v63 = vadd.f32 %v2808_v59, %v3404_v8 }
 0x17b   : > { %v1273_v0 = vpop.f32.mrf.mxu0  ;;  %v1529_v1 = vpop.f32.mrf.mxu1 }
 0x17c   : > { %2311 = vst [vmem:[%s3411_s22 + $0x128] sm:$0xff] %v2183_v60  ;;  %2375 = vst [vmem:[%s3411_s22 + $0x328] sm:$0xff] %v2247_v61  ;;  %v2188_v2 = vmax.f32 %v2060_v62, 0.0  ;;  %v2252_v3 = vmax.f32 %v2124_v63, 0.0  ;;  %v2058_v4 = vadd.f32 %v3404_v8, %v1273_v0  ;;  %v2122_v5 = vadd.f32 %v3404_v8, %v1529_v1 }
 0x17d   : > { %v2745_v6 = vpop.f32.mrf.mxu0  ;;  %v2809_v7 = vpop.f32.mrf.mxu1 }
 0x17e   : > { %2316 = vst [vmem:[%s3411_s22 + $0x150] sm:$0xff] %v2188_v2  ;;  %2380 = vst [vmem:[%s3411_s22 + $0x350] sm:$0xff] %v2252_v3  ;;  %v2186_v9 = vmax.f32 %v2058_v4, 0.0  ;;  %v2250_v10 = vmax.f32 %v2122_v5, 0.0  ;;  %v2061_v11 = vadd.f32 %v2745_v6, %v3404_v8  ;;  %v2125_v12 = vadd.f32 %v2809_v7, %v3404_v8 }
 0x17f   : > { %v1276_v13 = vpop.f32.mrf.mxu0  ;;  %v1532_v14 = vpop.f32.mrf.mxu1 }
 0x180   : > { %2314 = vst [vmem:[%s3411_s22 + $0x140] sm:$0xff] %v2186_v9  ;;  %2378 = vst [vmem:[%s3411_s22 + $0x340] sm:$0xff] %v2250_v10  ;;  %v2189_v15 = vmax.f32 %v2061_v11, 0.0  ;;  %v2253_v16 = vmax.f32 %v2125_v12, 0.0  ;;  %v2059_v17 = vadd.f32 %v3404_v8, %v1276_v13  ;;  %v2123_v18 = vadd.f32 %v3404_v8, %v1532_v14 }
 0x181   : > { %v2748_v19 = vpop.f32.mrf.mxu0  ;;  %v2812_v20 = vpop.f32.mrf.mxu1 }
 0x182   : > { %2317 = vst [vmem:[%s3411_s22 + $0x158] sm:$0xff] %v2189_v15  ;;  %2381 = vst [vmem:[%s3411_s22 + $0x358] sm:$0xff] %v2253_v16  ;;  %v2187_v21 = vmax.f32 %v2059_v17, 0.0  ;;  %v2251_v22 = vmax.f32 %v2123_v18, 0.0  ;;  %v2064_v23 = vadd.f32 %v2748_v19, %v3404_v8  ;;  %v2128_v24 = vadd.f32 %v2812_v20, %v3404_v8 }
 0x183   : > { %v1289_v25 = vpop.f32.mrf.mxu0  ;;  %v1545_v26 = vpop.f32.mrf.mxu1 }
 0x184   : > { %2315 = vst [vmem:[%s3411_s22 + $0x148] sm:$0xff] %v2187_v21  ;;  %2379 = vst [vmem:[%s3411_s22 + $0x348] sm:$0xff] %v2251_v22  ;;  %v2192_v27 = vmax.f32 %v2064_v23, 0.0  ;;  %v2256_v28 = vmax.f32 %v2128_v24, 0.0  ;;  %v2062_v29 = vadd.f32 %v3404_v8, %v1289_v25  ;;  %v2126_v30 = vadd.f32 %v3404_v8, %v1545_v26 }
 0x185   : > { %v2749_v31 = vpop.f32.mrf.mxu0  ;;  %v2813_v32 = vpop.f32.mrf.mxu1 }
 0x186   : > { %2320 = vst [vmem:[%s3411_s22 + $0x170] sm:$0xff] %v2192_v27  ;;  %2384 = vst [vmem:[%s3411_s22 + $0x370] sm:$0xff] %v2256_v28  ;;  %v2190_v33 = vmax.f32 %v2062_v29, 0.0  ;;  %v2254_v34 = vmax.f32 %v2126_v30, 0.0  ;;  %v2065_v35 = vadd.f32 %v2749_v31, %v3404_v8  ;;  %v2129_v36 = vadd.f32 %v2813_v32, %v3404_v8 }
 0x187   : > { %v1292_v37 = vpop.f32.mrf.mxu0  ;;  %v1548_v38 = vpop.f32.mrf.mxu1 }
 0x188   : > { %2318 = vst [vmem:[%s3411_s22 + $0x160] sm:$0xff] %v2190_v33  ;;  %2382 = vst [vmem:[%s3411_s22 + $0x360] sm:$0xff] %v2254_v34  ;;  %v2193_v39 = vmax.f32 %v2065_v35, 0.0  ;;  %v2257_v40 = vmax.f32 %v2129_v36, 0.0  ;;  %v2063_v41 = vadd.f32 %v3404_v8, %v1292_v37  ;;  %v2127_v42 = vadd.f32 %v3404_v8, %v1548_v38 }
 0x189   : > { %v2752_v43 = vpop.f32.mrf.mxu0  ;;  %v2816_v44 = vpop.f32.mrf.mxu1 }
 0x18a   : > { %2321 = vst [vmem:[%s3411_s22 + $0x178] sm:$0xff] %v2193_v39  ;;  %2385 = vst [vmem:[%s3411_s22 + $0x378] sm:$0xff] %v2257_v40  ;;  %v2191_v45 = vmax.f32 %v2063_v41, 0.0  ;;  %v2255_v46 = vmax.f32 %v2127_v42, 0.0  ;;  %v2068_v47 = vadd.f32 %v2752_v43, %v3404_v8  ;;  %v2132_v48 = vadd.f32 %v2816_v44, %v3404_v8 }
 0x18b   : > { %v1305_v49 = vpop.f32.mrf.mxu0  ;;  %v1561_v50 = vpop.f32.mrf.mxu1 }
 0x18c   : > { %2319 = vst [vmem:[%s3411_s22 + $0x168] sm:$0xff] %v2191_v45  ;;  %2383 = vst [vmem:[%s3411_s22 + $0x368] sm:$0xff] %v2255_v46  ;;  %v2196_v51 = vmax.f32 %v2068_v47, 0.0  ;;  %v2260_v52 = vmax.f32 %v2132_v48, 0.0  ;;  %v2066_v53 = vadd.f32 %v3404_v8, %v1305_v49  ;;  %v2130_v54 = vadd.f32 %v3404_v8, %v1561_v50 }
 0x18d   : > { %v2753_v55 = vpop.f32.mrf.mxu0  ;;  %v2817_v56 = vpop.f32.mrf.mxu1 }
 0x18e   : > { %2324 = vst [vmem:[%s3411_s22 + $0x190] sm:$0xff] %v2196_v51  ;;  %2388 = vst [vmem:[%s3411_s22 + $0x390] sm:$0xff] %v2260_v52  ;;  %v2194_v57 = vmax.f32 %v2066_v53, 0.0  ;;  %v2258_v58 = vmax.f32 %v2130_v54, 0.0  ;;  %v2069_v59 = vadd.f32 %v2753_v55, %v3404_v8  ;;  %v2133_v60 = vadd.f32 %v2817_v56, %v3404_v8 }
 0x18f   : > { %v1308_v61 = vpop.f32.mrf.mxu0  ;;  %v1564_v62 = vpop.f32.mrf.mxu1 }
 0x190   : > { %2322 = vst [vmem:[%s3411_s22 + $0x180] sm:$0xff] %v2194_v57  ;;  %2386 = vst [vmem:[%s3411_s22 + $0x380] sm:$0xff] %v2258_v58  ;;  %v2197_v63 = vmax.f32 %v2069_v59, 0.0  ;;  %v2261_v0 = vmax.f32 %v2133_v60, 0.0  ;;  %v2067_v1 = vadd.f32 %v3404_v8, %v1308_v61  ;;  %v2131_v2 = vadd.f32 %v3404_v8, %v1564_v62 }
 0x191   : > { %v2756_v3 = vpop.f32.mrf.mxu0  ;;  %v2820_v4 = vpop.f32.mrf.mxu1 }
 0x192   : > { %2325 = vst [vmem:[%s3411_s22 + $0x198] sm:$0xff] %v2197_v63  ;;  %2389 = vst [vmem:[%s3411_s22 + $0x398] sm:$0xff] %v2261_v0  ;;  %v2195_v5 = vmax.f32 %v2067_v1, 0.0  ;;  %v2259_v6 = vmax.f32 %v2131_v2, 0.0  ;;  %v2072_v7 = vadd.f32 %v2756_v3, %v3404_v8  ;;  %v2136_v9 = vadd.f32 %v2820_v4, %v3404_v8 }
 0x193   : > { %v1321_v10 = vpop.f32.mrf.mxu0  ;;  %v1577_v11 = vpop.f32.mrf.mxu1 }
 0x194   : > { %2323 = vst [vmem:[%s3411_s22 + $0x188] sm:$0xff] %v2195_v5  ;;  %2387 = vst [vmem:[%s3411_s22 + $0x388] sm:$0xff] %v2259_v6  ;;  %v2200_v12 = vmax.f32 %v2072_v7, 0.0  ;;  %v2264_v13 = vmax.f32 %v2136_v9, 0.0  ;;  %v2070_v14 = vadd.f32 %v3404_v8, %v1321_v10  ;;  %v2134_v15 = vadd.f32 %v3404_v8, %v1577_v11 }
 0x195   : > { %v2757_v16 = vpop.f32.mrf.mxu0  ;;  %v2821_v17 = vpop.f32.mrf.mxu1 }
 0x196   : > { %2328 = vst [vmem:[%s3411_s22 + $0x1b0] sm:$0xff] %v2200_v12  ;;  %2392 = vst [vmem:[%s3411_s22 + $0x3b0] sm:$0xff] %v2264_v13  ;;  %v2198_v18 = vmax.f32 %v2070_v14, 0.0  ;;  %v2262_v19 = vmax.f32 %v2134_v15, 0.0  ;;  %v2073_v20 = vadd.f32 %v2757_v16, %v3404_v8  ;;  %v2137_v21 = vadd.f32 %v2821_v17, %v3404_v8 }
 0x197   : > { %v1324_v22 = vpop.f32.mrf.mxu0  ;;  %v1580_v23 = vpop.f32.mrf.mxu1 }
 0x198   : > { %2326 = vst [vmem:[%s3411_s22 + $0x1a0] sm:$0xff] %v2198_v18  ;;  %2390 = vst [vmem:[%s3411_s22 + $0x3a0] sm:$0xff] %v2262_v19  ;;  %v2201_v24 = vmax.f32 %v2073_v20, 0.0  ;;  %v2265_v25 = vmax.f32 %v2137_v21, 0.0  ;;  %v2071_v26 = vadd.f32 %v3404_v8, %v1324_v22  ;;  %v2135_v27 = vadd.f32 %v3404_v8, %v1580_v23 }
 0x199   : > { %v2760_v28 = vpop.f32.mrf.mxu0  ;;  %v2824_v29 = vpop.f32.mrf.mxu1 }
 0x19a   : > { %2329 = vst [vmem:[%s3411_s22 + $0x1b8] sm:$0xff] %v2201_v24  ;;  %2393 = vst [vmem:[%s3411_s22 + $0x3b8] sm:$0xff] %v2265_v25  ;;  %v2199_v30 = vmax.f32 %v2071_v26, 0.0  ;;  %v2263_v31 = vmax.f32 %v2135_v27, 0.0  ;;  %v2076_v32 = vadd.f32 %v2760_v28, %v3404_v8  ;;  %v2140_v33 = vadd.f32 %v2824_v29, %v3404_v8 }
 0x19b   : > { %v1337_v34 = vpop.f32.mrf.mxu0  ;;  %v1593_v35 = vpop.f32.mrf.mxu1 }
 0x19c   : > { %2327 = vst [vmem:[%s3411_s22 + $0x1a8] sm:$0xff] %v2199_v30  ;;  %2391 = vst [vmem:[%s3411_s22 + $0x3a8] sm:$0xff] %v2263_v31  ;;  %v2204_v36 = vmax.f32 %v2076_v32, 0.0  ;;  %v2268_v37 = vmax.f32 %v2140_v33, 0.0  ;;  %v2074_v38 = vadd.f32 %v3404_v8, %v1337_v34  ;;  %v2138_v39 = vadd.f32 %v3404_v8, %v1593_v35 }
 0x19d   : > { %v2761_v40 = vpop.f32.mrf.mxu0  ;;  %v2825_v41 = vpop.f32.mrf.mxu1 }
 0x19e   : > { %2332 = vst [vmem:[%s3411_s22 + $0x1d0] sm:$0xff] %v2204_v36  ;;  %2396 = vst [vmem:[%s3411_s22 + $0x3d0] sm:$0xff] %v2268_v37  ;;  %v2202_v42 = vmax.f32 %v2074_v38, 0.0  ;;  %v2266_v43 = vmax.f32 %v2138_v39, 0.0  ;;  %v2077_v44 = vadd.f32 %v2761_v40, %v3404_v8  ;;  %v2141_v45 = vadd.f32 %v2825_v41, %v3404_v8 }
 0x19f   : > { %v1340_v46 = vpop.f32.mrf.mxu0  ;;  %v1596_v47 = vpop.f32.mrf.mxu1 }
 0x1a0   : > { %2330 = vst [vmem:[%s3411_s22 + $0x1c0] sm:$0xff] %v2202_v42  ;;  %2394 = vst [vmem:[%s3411_s22 + $0x3c0] sm:$0xff] %v2266_v43  ;;  %v2205_v48 = vmax.f32 %v2077_v44, 0.0  ;;  %v2269_v49 = vmax.f32 %v2141_v45, 0.0  ;;  %v2075_v50 = vadd.f32 %v3404_v8, %v1340_v46  ;;  %v2139_v51 = vadd.f32 %v3404_v8, %v1596_v47 }
 0x1a1   : > { %v2764_v52 = vpop.f32.mrf.mxu0  ;;  %v2828_v53 = vpop.f32.mrf.mxu1 }
 0x1a2   : > { %2333 = vst [vmem:[%s3411_s22 + $0x1d8] sm:$0xff] %v2205_v48  ;;  %2397 = vst [vmem:[%s3411_s22 + $0x3d8] sm:$0xff] %v2269_v49  ;;  %v2203_v54 = vmax.f32 %v2075_v50, 0.0  ;;  %v2267_v55 = vmax.f32 %v2139_v51, 0.0  ;;  %v2080_v56 = vadd.f32 %v2764_v52, %v3404_v8  ;;  %v2144_v57 = vadd.f32 %v2828_v53, %v3404_v8 }
 0x1a3   : > { %v1353_v58 = vpop.f32.mrf.mxu0  ;;  %v1609_v59 = vpop.f32.mrf.mxu1 }
 0x1a4   : > { %2331 = vst [vmem:[%s3411_s22 + $0x1c8] sm:$0xff] %v2203_v54  ;;  %2395 = vst [vmem:[%s3411_s22 + $0x3c8] sm:$0xff] %v2267_v55  ;;  %v2208_v60 = vmax.f32 %v2080_v56, 0.0  ;;  %v2272_v61 = vmax.f32 %v2144_v57, 0.0  ;;  %v2078_v62 = vadd.f32 %v3404_v8, %v1353_v58  ;;  %v2142_v63 = vadd.f32 %v3404_v8, %v1609_v59 }
 0x1a5   : > { %v2765_v0 = vpop.f32.mrf.mxu0  ;;  %v2829_v1 = vpop.f32.mrf.mxu1 }
 0x1a6   : > { %2336 = vst [vmem:[%s3411_s22 + $0x1f0] sm:$0xff] %v2208_v60  ;;  %2400 = vst [vmem:[%s3411_s22 + $0x3f0] sm:$0xff] %v2272_v61  ;;  %v2206_v2 = vmax.f32 %v2078_v62, 0.0  ;;  %v2270_v3 = vmax.f32 %v2142_v63, 0.0  ;;  %v2081_v4 = vadd.f32 %v2765_v0, %v3404_v8  ;;  %v2145_v5 = vadd.f32 %v2829_v1, %v3404_v8 }
 0x1a7   : > { %v1356_v6 = vpop.f32.mrf.mxu0  ;;  %v1612_v7 = vpop.f32.mrf.mxu1 }
 0x1a8   : > { %2334 = vst [vmem:[%s3411_s22 + $0x1e0] sm:$0xff] %v2206_v2  ;;  %2398 = vst [vmem:[%s3411_s22 + $0x3e0] sm:$0xff] %v2270_v3  ;;  %v2209_v9 = vmax.f32 %v2081_v4, 0.0  ;;  %v2273_v10 = vmax.f32 %v2145_v5, 0.0  ;;  %v2079_v11 = vadd.f32 %v3404_v8, %v1356_v6  ;;  %v2143_v12 = vadd.f32 %v3404_v8, %v1612_v7 }
 0x1aa   : > { %2337 = vst [vmem:[%s3411_s22 + $0x1f8] sm:$0xff] %v2209_v9  ;;  %2401 = vst [vmem:[%s3411_s22 + $0x3f8] sm:$0xff] %v2273_v10  ;;  %v2207_v13 = vmax.f32 %v2079_v11, 0.0  ;;  %v2271_v14 = vmax.f32 %v2143_v12, 0.0 }
 0x1ac   : > { %2335 = vst [vmem:[%s3411_s22 + $0x1e8] sm:$0xff] %v2207_v13  ;;  %2399 = vst [vmem:[%s3411_s22 + $0x3e8] sm:$0xff] %v2271_v14 }
 0x1ad   : > { %3098 = shalt.err (!%p3095_p2)
}
 0x1ae   : > { %s3099_s29 = scalar_lea.hbm %s3666_s10, 16384  ;;  %s3103_s6 = scalar_lea.hbm %s3722_s3, 131072 }
 0x1af   : > { %p3100_p9 = scmp.ne.s32.totalorder %s3666_s10, %s3099_s29  ;;  %p3104_p13 = scmp.lt.s32.totalorder %s3666_s10, %s3722_s3 }
 0x1b0   : > { %p3105_p7 = scmp.lt.s32.totalorder %s3103_s6, %s3099_s29 }
 0x1b1   : > { %p3101_p11 = pnand %p3100_p9, %p3296_p5 }
 0x1b2   : > { %p3106_p3 = por %p3105_p7, %p3104_p13 }
 0x1b3   : > { %p3102_p12 = pneg %p3101_p11 }
 0x1b5   : > { %p3107_p1 = pnand %p3106_p3, %p3102_p12 }
 0x1b7   : > { %3110 = shalt.err (!%p3107_p1)
}
 0x1b8   : > { %s3177_s22 = smov 128   ;;  %s3178_s24 = smov 8  }
 0x1b9   : > { %2856 = dma.vmem_to_hbm [thread:$0]  (%p3296_p5), %s3668_s5, 16384, %s3666_s10, %s2403_s15, %s3177_s22, %s3177_s22, %s3178_s24  }
 0x1ba PF: > { %p2878_p4 = scmp.ge.s32.totalorder %s3169_s17, 2  ;;  %s2431_s8 = sand.u32 1, %s3149_s12  }
 0x1bb   : > { %p3733_p6 = scmp.ne.s32.totalorder %s3727_s23, 0  ;;  %s2432_s9 = scalar_lea.sflag [#allocation5], %s2431_s8 }
 0x1bd   : > { %p2870_p8 = pnand %p2878_p4, %p3733_p6 }
 0x1bf   : > { %p2871_p0 = pneg %p2870_p8 }
 0x1c1   : > { %3144 = dma.done.wait (%p2871_p0), %s2432_s9, 16384  }
 0x1c2   : > { %3146 = vsyncadd (%p2871_p0), %s2432_s9, 4294950912  ;;  %s20_s17 = sadd.s32 1, %s3169_s17   ;;  %s3734_s12 = smov %s3153_s13 }
 0x1c3   : > { %p17_p10 = scmp.ge.s32.totalorder %s20_s17, 10   ;;  %s3735_s13 = smov %s3157_s14 }
 0x1c4   : > { %s3736_s14 = smov %s3305_s30  ;;  %s3737_s15 = smov %s3165_s16 }
 0x1c5   : > { %s3738_s16 = smov %s3740_s18  ;;  %19 = sbr.rel (!%p17_p10) target bundleno = 7 (0x7), region = 94 }
 0x1ca   :  { %2437 = vsyncpa [#allocation4], 1 }
 0x1cb   :  { %2439 = vsyncpa [#allocation4 + $0x1], 1 }
 0x1cc   :  { %2440 = vsyncpa [#allocation7], 1 }
 0x1cd   :  { %2441 = vsyncpa [#allocation5], 1 }
 0x1ce   :  { %2443 = vsyncpa [#allocation5 + $0x1], 1 }

</bundles_post_ra>
